<compile_context>
chip_gen: v7x
topology: tpu7x:2x2x1
jax: 0.10.0
libtpu: 0.0.40
codegen_flags: <defaults>
</compile_context>

<pallas_src>
import jax
import jax.numpy as jnp
from jax.experimental import pallas as pl
from jax.experimental.pallas import tpu as pltpu

# ---- small shapes consistent with the module (scaled down from the original constants) ----
SEQ_LEN = 8           # original: 16
BATCH = 2
INPUT_FEATURES = 128  # original: 512 (ResNet18 feature dim)
HIDDEN = 32           # original: 128
NUM_LAYERS = 2
OUTPUT_DIM = 2
IMG_C, IMG_H, IMG_W = 4, 16, 16

N_IMAGES = SEQ_LEN * BATCH      # rows fed to the CNN (= T * B)
HW = IMG_H * IMG_W


# --------------------------------------------------------------------------------------
# Single fused kernel: CNN stand-in + 2-layer tanh RNN + final Linear. Whole working set
# (<100 KB) is VMEM-resident; only the (B, OUTPUT_DIM) result goes back to HBM.
# --------------------------------------------------------------------------------------
def rnn_model_kernel(img_ref, wcnn_ref, bcnn_ref,
                     wih0_ref, whh0_ref, b0_ref,
                     w1_ref, b1_ref,
                     wout_ref, bout_ref,
                     out_ref, flat_scr):
    T, B, H = SEQ_LEN, BATCH, HIDDEN

    # ---- stand-in CNN: mean pool over HxW (lane reduce), then one (N, C) @ (C, F) matmul ----
    pooled = jnp.mean(img_ref[...], axis=-1)                         # (N, C) f32
    feats = (jnp.dot(pooled.astype(jnp.bfloat16), wcnn_ref[...],
                     preferred_element_type=jnp.float32)
             + bcnn_ref[...])                                        # (N, F) f32

    # ---- layer-0 input projection hoisted out of the recurrence (b_ih0 + b_hh0 folded in) ----
    xw0 = (jnp.dot(feats.astype(jnp.bfloat16), wih0_ref[...],
                   preferred_element_type=jnp.float32)
           + b0_ref[...])                                            # (N, H) f32

    whh0 = whh0_ref[...]                                             # (H, H)  bf16
    w1 = w1_ref[...]                                                 # (2H, H) bf16 = [wih1; whh1]
    b1 = jnp.broadcast_to(b1_ref[...], (B, H))                       # hoisted broadcast (f32)

    # ---- 2-layer tanh RNN: two serialized MXU matmuls per step on the critical path ----
    h0 = jnp.zeros((B, H), jnp.float32)
    h1 = jnp.zeros((B, H), jnp.float32)
    for t in range(T):                                               # static unroll, T = 8
        h0 = jnp.tanh(xw0[t * B:(t + 1) * B, :]
                      + jnp.dot(h0.astype(jnp.bfloat16), whh0,
                                preferred_element_type=jnp.float32))
        x1 = jnp.concatenate([h0, h1], axis=1).astype(jnp.bfloat16)  # (B, 2H)
        h1 = jnp.tanh(jnp.dot(x1, w1, preferred_element_type=jnp.float32) + b1)
        # Stage directly into the PyTorch output.view(-1, T*H) layout:
        #   flat[r, j*H:(j+1)*H] = output[t, b, :]   where   r*T + j == t*B + b
        for b in range(B):
            k = t * B + b
            r, j = k // T, k % T
            flat_scr[r:r + 1, j * H:(j + 1) * H] = h1[b:b + 1, :]

    # ---- final Linear: ONE (B, T*H) @ (T*H, OUT) matmul ----
    out_ref[...] = (jnp.dot(flat_scr[...].astype(jnp.bfloat16), wout_ref[...],
                            preferred_element_type=jnp.float32)
                    + bout_ref[...]).astype(out_ref.dtype)


def _full_spec(shape):
    ndim = len(shape)
    return pl.BlockSpec(shape, lambda i: (0,) * ndim)


def prepare_params(params):
    """One-time weight prep (bf16 casts, bias pre-sums, layer-1 weight concat).

    Called once at parameter-load time so no per-call host/device prep remains.
    """
    return {
        "wcnn": params["cnn_w"].astype(jnp.bfloat16),                          # (C, F)
        "bcnn": params["cnn_b"],                                               # (1, F) f32
        "wih0": params["l0_wih_t"].astype(jnp.bfloat16),                       # (F, H)
        "whh0": params["l0_whh_t"].astype(jnp.bfloat16),                       # (H, H)
        "b0": params["l0_bih"] + params["l0_bhh"],                             # (1, H) f32
        "w1": jnp.concatenate([params["l1_wih_t"], params["l1_whh_t"]],
                              axis=0).astype(jnp.bfloat16),                    # (2H, H)
        "b1": params["l1_bih"] + params["l1_bhh"],                             # (1, H) f32
        "wout": params["out_w_t"].astype(jnp.bfloat16),                        # (T*H, OUT)
        "bout": params["out_b"],                                               # (1, OUT) f32
    }


@jax.jit
def rnn_model_forward(images, prep):
    """Full forward pass: one fused pallas_call; the only per-call op is a metadata reshape."""
    img3 = images.reshape(N_IMAGES, IMG_C, HW)                                 # (N, C, HW) f32
    args = (img3, prep["wcnn"], prep["bcnn"], prep["wih0"], prep["whh0"], prep["b0"],
            prep["w1"], prep["b1"], prep["wout"], prep["bout"])
    return pl.pallas_call(
        rnn_model_kernel,
        out_shape=jax.ShapeDtypeStruct((BATCH, OUTPUT_DIM), jnp.float32),
        grid=(1,),
        in_specs=[_full_spec(a.shape) for a in args],
        out_specs=_full_spec((BATCH, OUTPUT_DIM)),
        scratch_shapes=[
            pltpu.VMEM((BATCH, SEQ_LEN * HIDDEN), jnp.float32),   # staged .view(-1, T*H) output
        ],
        compiler_params=pltpu.CompilerParams(dimension_semantics=("arbitrary",)),
    )(*args)


# --------------------------------------------------------------------------------------
# Parameter init (deterministic, synthetic) and a pure-JAX reference for a tolerance check.
# --------------------------------------------------------------------------------------
def init_params(key):
    params = {}
    k = iter(jax.random.split(key, 16))
    scale = 0.1
    params["cnn_w"] = scale * jax.random.normal(next(k), (IMG_C, INPUT_FEATURES), jnp.float32)
    params["cnn_b"] = scale * jax.random.normal(next(k), (1, INPUT_FEATURES), jnp.float32)
    for layer in range(NUM_LAYERS):
        fin = INPUT_FEATURES if layer == 0 else HIDDEN
        pfx = f"l{layer}"
        params[pfx + "_wih_t"] = scale * jax.random.normal(next(k), (fin, HIDDEN), jnp.float32)
        params[pfx + "_whh_t"] = scale * jax.random.normal(next(k), (HIDDEN, HIDDEN), jnp.float32)
        params[pfx + "_bih"] = scale * jax.random.normal(next(k), (1, HIDDEN), jnp.float32)
        params[pfx + "_bhh"] = scale * jax.random.normal(next(k), (1, HIDDEN), jnp.float32)
    params["out_w_t"] = scale * jax.random.normal(
        next(k), (SEQ_LEN * HIDDEN, OUTPUT_DIM), jnp.float32)
    params["out_b"] = scale * jax.random.normal(next(k), (1, OUTPUT_DIM), jnp.float32)
    return params


def reference_forward(images, params):
    """Pure-JAX f32 reference mirroring the PyTorch module."""
    pooled = jnp.mean(images.reshape(N_IMAGES, IMG_C, HW), axis=-1)              # (N, C)
    feats = pooled @ params["cnn_w"] + params["cnn_b"]                           # (N, F)
    layer_in = feats.reshape(SEQ_LEN, BATCH, INPUT_FEATURES)                     # (T, B, F)
    for layer in range(NUM_LAYERS):
        wih = params[f"l{layer}_wih_t"]
        whh = params[f"l{layer}_whh_t"]
        b = params[f"l{layer}_bih"] + params[f"l{layer}_bhh"]
        h = jnp.zeros((BATCH, HIDDEN), jnp.float32)
        outs = []
        for t in range(SEQ_LEN):
            h = jnp.tanh(layer_in[t] @ wih + h @ whh + b)
            outs.append(h)
        layer_in = jnp.stack(outs, axis=0)                                       # (T, B, H)
    flat = layer_in.reshape(-1, SEQ_LEN * HIDDEN)                                # (B, T*H)
    return flat @ params["out_w_t"] + params["out_b"]


if __name__ == "__main__":
    key = jax.random.PRNGKey(0)
    k_img, k_par = jax.random.split(key)
    # N = seq_len * batch images, NCHW
    images = jax.random.normal(k_img, (SEQ_LEN * BATCH, IMG_C, IMG_H, IMG_W), jnp.float32)
    params = init_params(k_par)
    prep = prepare_params(params)          # one-time prep, outside the per-call path

    pred = rnn_model_forward(images, prep)
    jax.block_until_ready(pred)
    assert pred.shape == (BATCH, OUTPUT_DIM), pred.shape

    ref = reference_forward(images, params)
    assert jnp.allclose(pred, ref, atol=5e-2, rtol=5e-2), (
        f"max abs diff {jnp.max(jnp.abs(pred - ref))}")

    print("KERNEL_OK")
</pallas_src>

<mosaic_0001>
module attributes {stable_mosaic.version = 11 : i64} {
  func.func @rnn_model_kernel(%arg0: i32, %arg1: memref<16x4x256xf32, #tpu.memory_space<vmem>>, %arg2: memref<4x128xbf16, #tpu.memory_space<vmem>>, %arg3: memref<1x128xf32, #tpu.memory_space<vmem>>, %arg4: memref<128x32xbf16, #tpu.memory_space<vmem>>, %arg5: memref<32x32xbf16, #tpu.memory_space<vmem>>, %arg6: memref<1x32xf32, #tpu.memory_space<vmem>>, %arg7: memref<64x32xbf16, #tpu.memory_space<vmem>>, %arg8: memref<1x32xf32, #tpu.memory_space<vmem>>, %arg9: memref<256x2xbf16, #tpu.memory_space<vmem>>, %arg10: memref<1x2xf32, #tpu.memory_space<vmem>>, %arg11: memref<2x2xf32, #tpu.memory_space<vmem>>, %arg12: memref<2x256xf32, #tpu.memory_space<vmem>>) attributes {dimension_semantics = [#tpu.dimension_semantics<arbitrary>], iteration_bounds = array<i64: 1>, scalar_prefetch = 0 : i64, scratch_operands = 1 : i64, tpu.core_type = #tpu.core_type<tc>, window_params = [{pipeline_mode = #tpu.pipeline_mode<synchronous>, transform_indices = @transform_0, window_bounds = array<i64: 16, 4, 256>}, {pipeline_mode = #tpu.pipeline_mode<synchronous>, transform_indices = @transform_1, window_bounds = array<i64: 4, 128>}, {pipeline_mode = #tpu.pipeline_mode<synchronous>, transform_indices = @transform_2, window_bounds = array<i64: 1, 128>}, {pipeline_mode = #tpu.pipeline_mode<synchronous>, transform_indices = @transform_3, window_bounds = array<i64: 128, 32>}, {pipeline_mode = #tpu.pipeline_mode<synchronous>, transform_indices = @transform_4, window_bounds = array<i64: 32, 32>}, {pipeline_mode = #tpu.pipeline_mode<synchronous>, transform_indices = @transform_5, window_bounds = array<i64: 1, 32>}, {pipeline_mode = #tpu.pipeline_mode<synchronous>, transform_indices = @transform_6, window_bounds = array<i64: 64, 32>}, {pipeline_mode = #tpu.pipeline_mode<synchronous>, transform_indices = @transform_7, window_bounds = array<i64: 1, 32>}, {pipeline_mode = #tpu.pipeline_mode<synchronous>, transform_indices = @transform_8, window_bounds = array<i64: 256, 2>}, {pipeline_mode = #tpu.pipeline_mode<synchronous>, transform_indices = @transform_9, window_bounds = array<i64: 1, 2>}, {pipeline_mode = #tpu.pipeline_mode<synchronous>, transform_indices = @transform_10, window_bounds = array<i64: 2, 2>}]} {
    %c0 = arith.constant 0 : index
    %c0_0 = arith.constant 0 : index
    %c0_1 = arith.constant 0 : index
    %0 = vector.load %arg1[%c0, %c0_0, %c0_1] : memref<16x4x256xf32, #tpu.memory_space<vmem>>, vector<16x4x256xf32>
    %cst = arith.constant dense<0.000000e+00> : vector<16x4xf32>
    %1 = vector.multi_reduction <add>, %0, %cst [2] : vector<16x4x256xf32> to vector<16x4xf32>
    %cst_2 = arith.constant 2.560000e+02 : f32
    %2 = vector.broadcast %cst_2 : f32 to vector<16x4xf32>
    %3 = arith.divf %1, %2 : vector<16x4xf32>
    %4 = arith.truncf %3 : vector<16x4xf32> to vector<16x4xbf16>
    %c0_3 = arith.constant 0 : index
    %c0_4 = arith.constant 0 : index
    %5 = vector.load %arg2[%c0_3, %c0_4] : memref<4x128xbf16, #tpu.memory_space<vmem>>, vector<4x128xbf16>
    %cst_5 = arith.constant dense<0.000000e+00> : vector<16x128xf32>
    %6 = tpu.matmul %4, %5, %cst_5 {dimension_numbers = #tpu.dot_dimension_numbers<[1], [0], [0], [1], [0, 0, 1, 1], [], []>} : vector<16x4xbf16>, vector<4x128xbf16>, vector<16x128xf32> -> vector<16x128xf32>
    %c0_6 = arith.constant 0 : index
    %c0_7 = arith.constant 0 : index
    %7 = vector.load %arg3[%c0_6, %c0_7] : memref<1x128xf32, #tpu.memory_space<vmem>>, vector<1x128xf32>
    %8 = vector.broadcast %7 : vector<1x128xf32> to vector<16x128xf32>
    %9 = arith.addf %6, %8 : vector<16x128xf32>
    %10 = arith.truncf %9 : vector<16x128xf32> to vector<16x128xbf16>
    %c0_8 = arith.constant 0 : index
    %c0_9 = arith.constant 0 : index
    %11 = vector.load %arg4[%c0_8, %c0_9] : memref<128x32xbf16, #tpu.memory_space<vmem>>, vector<128x32xbf16>
    %cst_10 = arith.constant dense<0.000000e+00> : vector<16x32xf32>
    %12 = tpu.matmul %10, %11, %cst_10 {dimension_numbers = #tpu.dot_dimension_numbers<[1], [0], [0], [1], [0, 0, 1, 1], [], []>} : vector<16x128xbf16>, vector<128x32xbf16>, vector<16x32xf32> -> vector<16x32xf32>
    %c0_11 = arith.constant 0 : index
    %c0_12 = arith.constant 0 : index
    %13 = vector.load %arg6[%c0_11, %c0_12] : memref<1x32xf32, #tpu.memory_space<vmem>>, vector<1x32xf32>
    %14 = vector.broadcast %13 : vector<1x32xf32> to vector<16x32xf32>
    %15 = arith.addf %12, %14 : vector<16x32xf32>
    %c0_13 = arith.constant 0 : index
    %c0_14 = arith.constant 0 : index
    %16 = vector.load %arg5[%c0_13, %c0_14] : memref<32x32xbf16, #tpu.memory_space<vmem>>, vector<32x32xbf16>
    %c0_15 = arith.constant 0 : index
    %c0_16 = arith.constant 0 : index
    %17 = vector.load %arg7[%c0_15, %c0_16] : memref<64x32xbf16, #tpu.memory_space<vmem>>, vector<64x32xbf16>
    %c0_17 = arith.constant 0 : index
    %c0_18 = arith.constant 0 : index
    %18 = vector.load %arg8[%c0_17, %c0_18] : memref<1x32xf32, #tpu.memory_space<vmem>>, vector<1x32xf32>
    %19 = vector.shape_cast %18 : vector<1x32xf32> to vector<1x32xf32>
    %20 = vector.broadcast %19 : vector<1x32xf32> to vector<2x32xf32>
    %cst_19 = arith.constant 0.000000e+00 : f32
    %21 = vector.broadcast %cst_19 : f32 to vector<2x32xf32>
    %cst_20 = arith.constant 0.000000e+00 : f32
    %22 = vector.broadcast %cst_20 : f32 to vector<2x32xf32>
    %23 = vector.extract_strided_slice %15 {offsets = [0, 0], sizes = [2, 32], strides = [1, 1]} : vector<16x32xf32> to vector<2x32xf32>
    %24 = arith.truncf %21 : vector<2x32xf32> to vector<2x32xbf16>
    %cst_21 = arith.constant dense<0.000000e+00> : vector<2x32xf32>
    %25 = tpu.matmul %24, %16, %cst_21 {dimension_numbers = #tpu.dot_dimension_numbers<[1], [0], [0], [1], [0, 0, 1, 1], [], []>} : vector<2x32xbf16>, vector<32x32xbf16>, vector<2x32xf32> -> vector<2x32xf32>
    %26 = arith.addf %23, %25 : vector<2x32xf32>
    %27 = math.tanh %26 : vector<2x32xf32>
    %28 = tpu.concatenate %27, %22 in 1 : vector<2x32xf32>, vector<2x32xf32> -> vector<2x64xf32>
    %29 = arith.truncf %28 : vector<2x64xf32> to vector<2x64xbf16>
    %cst_22 = arith.constant dense<0.000000e+00> : vector<2x32xf32>
    %30 = tpu.matmul %29, %17, %cst_22 {dimension_numbers = #tpu.dot_dimension_numbers<[1], [0], [0], [1], [0, 0, 1, 1], [], []>} : vector<2x64xbf16>, vector<64x32xbf16>, vector<2x32xf32> -> vector<2x32xf32>
    %31 = arith.addf %30, %20 : vector<2x32xf32>
    %32 = math.tanh %31 : vector<2x32xf32>
    %33 = vector.extract_strided_slice %32 {offsets = [0, 0], sizes = [1, 32], strides = [1, 1]} : vector<2x32xf32> to vector<1x32xf32>
    %c0_23 = arith.constant 0 : index
    %c0_24 = arith.constant 0 : index
    %34 = vector.load %arg12[%c0_23, %c0_24] : memref<2x256xf32, #tpu.memory_space<vmem>>, vector<1x32xf32>
    tpu.vector_store %arg12[%c0_23, %c0_24], %33 {strides = array<i32>} : memref<2x256xf32, #tpu.memory_space<vmem>>, vector<1x32xf32>,
    %35 = vector.extract_strided_slice %32 {offsets = [1, 0], sizes = [1, 32], strides = [1, 1]} : vector<2x32xf32> to vector<1x32xf32>
    %c0_25 = arith.constant 0 : index
    %c32 = arith.constant 32 : index
    %36 = vector.load %arg12[%c0_25, %c32] : memref<2x256xf32, #tpu.memory_space<vmem>>, vector<1x32xf32>
    tpu.vector_store %arg12[%c0_25, %c32], %35 {strides = array<i32>} : memref<2x256xf32, #tpu.memory_space<vmem>>, vector<1x32xf32>,
    %37 = vector.extract_strided_slice %15 {offsets = [2, 0], sizes = [2, 32], strides = [1, 1]} : vector<16x32xf32> to vector<2x32xf32>
    %38 = arith.truncf %27 : vector<2x32xf32> to vector<2x32xbf16>
    %cst_26 = arith.constant dense<0.000000e+00> : vector<2x32xf32>
    %39 = tpu.matmul %38, %16, %cst_26 {dimension_numbers = #tpu.dot_dimension_numbers<[1], [0], [0], [1], [0, 0, 1, 1], [], []>} : vector<2x32xbf16>, vector<32x32xbf16>, vector<2x32xf32> -> vector<2x32xf32>
    %40 = arith.addf %37, %39 : vector<2x32xf32>
    %41 = math.tanh %40 : vector<2x32xf32>
    %42 = tpu.concatenate %41, %32 in 1 : vector<2x32xf32>, vector<2x32xf32> -> vector<2x64xf32>
    %43 = arith.truncf %42 : vector<2x64xf32> to vector<2x64xbf16>
    %cst_27 = arith.constant dense<0.000000e+00> : vector<2x32xf32>
    %44 = tpu.matmul %43, %17, %cst_27 {dimension_numbers = #tpu.dot_dimension_numbers<[1], [0], [0], [1], [0, 0, 1, 1], [], []>} : vector<2x64xbf16>, vector<64x32xbf16>, vector<2x32xf32> -> vector<2x32xf32>
    %45 = arith.addf %44, %20 : vector<2x32xf32>
    %46 = math.tanh %45 : vector<2x32xf32>
    %47 = vector.extract_strided_slice %46 {offsets = [0, 0], sizes = [1, 32], strides = [1, 1]} : vector<2x32xf32> to vector<1x32xf32>
    %c0_28 = arith.constant 0 : index
    %c64 = arith.constant 64 : index
    %48 = vector.load %arg12[%c0_28, %c64] : memref<2x256xf32, #tpu.memory_space<vmem>>, vector<1x32xf32>
    tpu.vector_store %arg12[%c0_28, %c64], %47 {strides = array<i32>} : memref<2x256xf32, #tpu.memory_space<vmem>>, vector<1x32xf32>,
    %49 = vector.extract_strided_slice %46 {offsets = [1, 0], sizes = [1, 32], strides = [1, 1]} : vector<2x32xf32> to vector<1x32xf32>
    %c0_29 = arith.constant 0 : index
    %c96 = arith.constant 96 : index
    %50 = vector.load %arg12[%c0_29, %c96] : memref<2x256xf32, #tpu.memory_space<vmem>>, vector<1x32xf32>
    tpu.vector_store %arg12[%c0_29, %c96], %49 {strides = array<i32>} : memref<2x256xf32, #tpu.memory_space<vmem>>, vector<1x32xf32>,
    %51 = vector.extract_strided_slice %15 {offsets = [4, 0], sizes = [2, 32], strides = [1, 1]} : vector<16x32xf32> to vector<2x32xf32>
    %52 = arith.truncf %41 : vector<2x32xf32> to vector<2x32xbf16>
    %cst_30 = arith.constant dense<0.000000e+00> : vector<2x32xf32>
    %53 = tpu.matmul %52, %16, %cst_30 {dimension_numbers = #tpu.dot_dimension_numbers<[1], [0], [0], [1], [0, 0, 1, 1], [], []>} : vector<2x32xbf16>, vector<32x32xbf16>, vector<2x32xf32> -> vector<2x32xf32>
    %54 = arith.addf %51, %53 : vector<2x32xf32>
    %55 = math.tanh %54 : vector<2x32xf32>
    %56 = tpu.concatenate %55, %46 in 1 : vector<2x32xf32>, vector<2x32xf32> -> vector<2x64xf32>
    %57 = arith.truncf %56 : vector<2x64xf32> to vector<2x64xbf16>
    %cst_31 = arith.constant dense<0.000000e+00> : vector<2x32xf32>
    %58 = tpu.matmul %57, %17, %cst_31 {dimension_numbers = #tpu.dot_dimension_numbers<[1], [0], [0], [1], [0, 0, 1, 1], [], []>} : vector<2x64xbf16>, vector<64x32xbf16>, vector<2x32xf32> -> vector<2x32xf32>
    %59 = arith.addf %58, %20 : vector<2x32xf32>
    %60 = math.tanh %59 : vector<2x32xf32>
    %61 = vector.extract_strided_slice %60 {offsets = [0, 0], sizes = [1, 32], strides = [1, 1]} : vector<2x32xf32> to vector<1x32xf32>
    %c0_32 = arith.constant 0 : index
    %c128 = arith.constant 128 : index
    %62 = vector.load %arg12[%c0_32, %c128] : memref<2x256xf32, #tpu.memory_space<vmem>>, vector<1x32xf32>
    tpu.vector_store %arg12[%c0_32, %c128], %61 {strides = array<i32>} : memref<2x256xf32, #tpu.memory_space<vmem>>, vector<1x32xf32>,
    %63 = vector.extract_strided_slice %60 {offsets = [1, 0], sizes = [1, 32], strides = [1, 1]} : vector<2x32xf32> to vector<1x32xf32>
    %c0_33 = arith.constant 0 : index
    %c160 = arith.constant 160 : index
    %64 = vector.load %arg12[%c0_33, %c160] : memref<2x256xf32, #tpu.memory_space<vmem>>, vector<1x32xf32>
    tpu.vector_store %arg12[%c0_33, %c160], %63 {strides = array<i32>} : memref<2x256xf32, #tpu.memory_space<vmem>>, vector<1x32xf32>,
    %65 = vector.extract_strided_slice %15 {offsets = [6, 0], sizes = [2, 32], strides = [1, 1]} : vector<16x32xf32> to vector<2x32xf32>
    %66 = arith.truncf %55 : vector<2x32xf32> to vector<2x32xbf16>
    %cst_34 = arith.constant dense<0.000000e+00> : vector<2x32xf32>
    %67 = tpu.matmul %66, %16, %cst_34 {dimension_numbers = #tpu.dot_dimension_numbers<[1], [0], [0], [1], [0, 0, 1, 1], [], []>} : vector<2x32xbf16>, vector<32x32xbf16>, vector<2x32xf32> -> vector<2x32xf32>
    %68 = arith.addf %65, %67 : vector<2x32xf32>
    %69 = math.tanh %68 : vector<2x32xf32>
    %70 = tpu.concatenate %69, %60 in 1 : vector<2x32xf32>, vector<2x32xf32> -> vector<2x64xf32>
    %71 = arith.truncf %70 : vector<2x64xf32> to vector<2x64xbf16>
    %cst_35 = arith.constant dense<0.000000e+00> : vector<2x32xf32>
    %72 = tpu.matmul %71, %17, %cst_35 {dimension_numbers = #tpu.dot_dimension_numbers<[1], [0], [0], [1], [0, 0, 1, 1], [], []>} : vector<2x64xbf16>, vector<64x32xbf16>, vector<2x32xf32> -> vector<2x32xf32>
    %73 = arith.addf %72, %20 : vector<2x32xf32>
    %74 = math.tanh %73 : vector<2x32xf32>
    %75 = vector.extract_strided_slice %74 {offsets = [0, 0], sizes = [1, 32], strides = [1, 1]} : vector<2x32xf32> to vector<1x32xf32>
    %c0_36 = arith.constant 0 : index
    %c192 = arith.constant 192 : index
    %76 = vector.load %arg12[%c0_36, %c192] : memref<2x256xf32, #tpu.memory_space<vmem>>, vector<1x32xf32>
    tpu.vector_store %arg12[%c0_36, %c192], %75 {strides = array<i32>} : memref<2x256xf32, #tpu.memory_space<vmem>>, vector<1x32xf32>,
    %77 = vector.extract_strided_slice %74 {offsets = [1, 0], sizes = [1, 32], strides = [1, 1]} : vector<2x32xf32> to vector<1x32xf32>
    %c0_37 = arith.constant 0 : index
    %c224 = arith.constant 224 : index
    %78 = vector.load %arg12[%c0_37, %c224] : memref<2x256xf32, #tpu.memory_space<vmem>>, vector<1x32xf32>
    tpu.vector_store %arg12[%c0_37, %c224], %77 {strides = array<i32>} : memref<2x256xf32, #tpu.memory_space<vmem>>, vector<1x32xf32>,
    %79 = vector.extract_strided_slice %15 {offsets = [8, 0], sizes = [2, 32], strides = [1, 1]} : vector<16x32xf32> to vector<2x32xf32>
    %80 = arith.truncf %69 : vector<2x32xf32> to vector<2x32xbf16>
    %cst_38 = arith.constant dense<0.000000e+00> : vector<2x32xf32>
    %81 = tpu.matmul %80, %16, %cst_38 {dimension_numbers = #tpu.dot_dimension_numbers<[1], [0], [0], [1], [0, 0, 1, 1], [], []>} : vector<2x32xbf16>, vector<32x32xbf16>, vector<2x32xf32> -> vector<2x32xf32>
    %82 = arith.addf %79, %81 : vector<2x32xf32>
    %83 = math.tanh %82 : vector<2x32xf32>
    %84 = tpu.concatenate %83, %74 in 1 : vector<2x32xf32>, vector<2x32xf32> -> vector<2x64xf32>
    %85 = arith.truncf %84 : vector<2x64xf32> to vector<2x64xbf16>
    %cst_39 = arith.constant dense<0.000000e+00> : vector<2x32xf32>
    %86 = tpu.matmul %85, %17, %cst_39 {dimension_numbers = #tpu.dot_dimension_numbers<[1], [0], [0], [1], [0, 0, 1, 1], [], []>} : vector<2x64xbf16>, vector<64x32xbf16>, vector<2x32xf32> -> vector<2x32xf32>
    %87 = arith.addf %86, %20 : vector<2x32xf32>
    %88 = math.tanh %87 : vector<2x32xf32>
    %89 = vector.extract_strided_slice %88 {offsets = [0, 0], sizes = [1, 32], strides = [1, 1]} : vector<2x32xf32> to vector<1x32xf32>
    %c1 = arith.constant 1 : index
    %c0_40 = arith.constant 0 : index
    %90 = vector.load %arg12[%c1, %c0_40] : memref<2x256xf32, #tpu.memory_space<vmem>>, vector<1x32xf32>
    tpu.vector_store %arg12[%c1, %c0_40], %89 {strides = array<i32>} : memref<2x256xf32, #tpu.memory_space<vmem>>, vector<1x32xf32>,
    %91 = vector.extract_strided_slice %88 {offsets = [1, 0], sizes = [1, 32], strides = [1, 1]} : vector<2x32xf32> to vector<1x32xf32>
    %c1_41 = arith.constant 1 : index
    %c32_42 = arith.constant 32 : index
    %92 = vector.load %arg12[%c1_41, %c32_42] : memref<2x256xf32, #tpu.memory_space<vmem>>, vector<1x32xf32>
    tpu.vector_store %arg12[%c1_41, %c32_42], %91 {strides = array<i32>} : memref<2x256xf32, #tpu.memory_space<vmem>>, vector<1x32xf32>,
    %93 = vector.extract_strided_slice %15 {offsets = [10, 0], sizes = [2, 32], strides = [1, 1]} : vector<16x32xf32> to vector<2x32xf32>
    %94 = arith.truncf %83 : vector<2x32xf32> to vector<2x32xbf16>
    %cst_43 = arith.constant dense<0.000000e+00> : vector<2x32xf32>
    %95 = tpu.matmul %94, %16, %cst_43 {dimension_numbers = #tpu.dot_dimension_numbers<[1], [0], [0], [1], [0, 0, 1, 1], [], []>} : vector<2x32xbf16>, vector<32x32xbf16>, vector<2x32xf32> -> vector<2x32xf32>
    %96 = arith.addf %93, %95 : vector<2x32xf32>
    %97 = math.tanh %96 : vector<2x32xf32>
    %98 = tpu.concatenate %97, %88 in 1 : vector<2x32xf32>, vector<2x32xf32> -> vector<2x64xf32>
    %99 = arith.truncf %98 : vector<2x64xf32> to vector<2x64xbf16>
    %cst_44 = arith.constant dense<0.000000e+00> : vector<2x32xf32>
    %100 = tpu.matmul %99, %17, %cst_44 {dimension_numbers = #tpu.dot_dimension_numbers<[1], [0], [0], [1], [0, 0, 1, 1], [], []>} : vector<2x64xbf16>, vector<64x32xbf16>, vector<2x32xf32> -> vector<2x32xf32>
    %101 = arith.addf %100, %20 : vector<2x32xf32>
    %102 = math.tanh %101 : vector<2x32xf32>
    %103 = vector.extract_strided_slice %102 {offsets = [0, 0], sizes = [1, 32], strides = [1, 1]} : vector<2x32xf32> to vector<1x32xf32>
    %c1_45 = arith.constant 1 : index
    %c64_46 = arith.constant 64 : index
    %104 = vector.load %arg12[%c1_45, %c64_46] : memref<2x256xf32, #tpu.memory_space<vmem>>, vector<1x32xf32>
    tpu.vector_store %arg12[%c1_45, %c64_46], %103 {strides = array<i32>} : memref<2x256xf32, #tpu.memory_space<vmem>>, vector<1x32xf32>,
    %105 = vector.extract_strided_slice %102 {offsets = [1, 0], sizes = [1, 32], strides = [1, 1]} : vector<2x32xf32> to vector<1x32xf32>
    %c1_47 = arith.constant 1 : index
    %c96_48 = arith.constant 96 : index
    %106 = vector.load %arg12[%c1_47, %c96_48] : memref<2x256xf32, #tpu.memory_space<vmem>>, vector<1x32xf32>
    tpu.vector_store %arg12[%c1_47, %c96_48], %105 {strides = array<i32>} : memref<2x256xf32, #tpu.memory_space<vmem>>, vector<1x32xf32>,
    %107 = vector.extract_strided_slice %15 {offsets = [12, 0], sizes = [2, 32], strides = [1, 1]} : vector<16x32xf32> to vector<2x32xf32>
    %108 = arith.truncf %97 : vector<2x32xf32> to vector<2x32xbf16>
    %cst_49 = arith.constant dense<0.000000e+00> : vector<2x32xf32>
    %109 = tpu.matmul %108, %16, %cst_49 {dimension_numbers = #tpu.dot_dimension_numbers<[1], [0], [0], [1], [0, 0, 1, 1], [], []>} : vector<2x32xbf16>, vector<32x32xbf16>, vector<2x32xf32> -> vector<2x32xf32>
    %110 = arith.addf %107, %109 : vector<2x32xf32>
    %111 = math.tanh %110 : vector<2x32xf32>
    %112 = tpu.concatenate %111, %102 in 1 : vector<2x32xf32>, vector<2x32xf32> -> vector<2x64xf32>
    %113 = arith.truncf %112 : vector<2x64xf32> to vector<2x64xbf16>
    %cst_50 = arith.constant dense<0.000000e+00> : vector<2x32xf32>
    %114 = tpu.matmul %113, %17, %cst_50 {dimension_numbers = #tpu.dot_dimension_numbers<[1], [0], [0], [1], [0, 0, 1, 1], [], []>} : vector<2x64xbf16>, vector<64x32xbf16>, vector<2x32xf32> -> vector<2x32xf32>
    %115 = arith.addf %114, %20 : vector<2x32xf32>
    %116 = math.tanh %115 : vector<2x32xf32>
    %117 = vector.extract_strided_slice %116 {offsets = [0, 0], sizes = [1, 32], strides = [1, 1]} : vector<2x32xf32> to vector<1x32xf32>
    %c1_51 = arith.constant 1 : index
    %c128_52 = arith.constant 128 : index
    %118 = vector.load %arg12[%c1_51, %c128_52] : memref<2x256xf32, #tpu.memory_space<vmem>>, vector<1x32xf32>
    tpu.vector_store %arg12[%c1_51, %c128_52], %117 {strides = array<i32>} : memref<2x256xf32, #tpu.memory_space<vmem>>, vector<1x32xf32>,
    %119 = vector.extract_strided_slice %116 {offsets = [1, 0], sizes = [1, 32], strides = [1, 1]} : vector<2x32xf32> to vector<1x32xf32>
    %c1_53 = arith.constant 1 : index
    %c160_54 = arith.constant 160 : index
    %120 = vector.load %arg12[%c1_53, %c160_54] : memref<2x256xf32, #tpu.memory_space<vmem>>, vector<1x32xf32>
    tpu.vector_store %arg12[%c1_53, %c160_54], %119 {strides = array<i32>} : memref<2x256xf32, #tpu.memory_space<vmem>>, vector<1x32xf32>,
    %121 = vector.extract_strided_slice %15 {offsets = [14, 0], sizes = [2, 32], strides = [1, 1]} : vector<16x32xf32> to vector<2x32xf32>
    %122 = arith.truncf %111 : vector<2x32xf32> to vector<2x32xbf16>
    %cst_55 = arith.constant dense<0.000000e+00> : vector<2x32xf32>
    %123 = tpu.matmul %122, %16, %cst_55 {dimension_numbers = #tpu.dot_dimension_numbers<[1], [0], [0], [1], [0, 0, 1, 1], [], []>} : vector<2x32xbf16>, vector<32x32xbf16>, vector<2x32xf32> -> vector<2x32xf32>
    %124 = arith.addf %121, %123 : vector<2x32xf32>
    %125 = math.tanh %124 : vector<2x32xf32>
    %126 = tpu.concatenate %125, %116 in 1 : vector<2x32xf32>, vector<2x32xf32> -> vector<2x64xf32>
    %127 = arith.truncf %126 : vector<2x64xf32> to vector<2x64xbf16>
    %cst_56 = arith.constant dense<0.000000e+00> : vector<2x32xf32>
    %128 = tpu.matmul %127, %17, %cst_56 {dimension_numbers = #tpu.dot_dimension_numbers<[1], [0], [0], [1], [0, 0, 1, 1], [], []>} : vector<2x64xbf16>, vector<64x32xbf16>, vector<2x32xf32> -> vector<2x32xf32>
    %129 = arith.addf %128, %20 : vector<2x32xf32>
    %130 = math.tanh %129 : vector<2x32xf32>
    %131 = vector.extract_strided_slice %130 {offsets = [0, 0], sizes = [1, 32], strides = [1, 1]} : vector<2x32xf32> to vector<1x32xf32>
    %c1_57 = arith.constant 1 : index
    %c192_58 = arith.constant 192 : index
    %132 = vector.load %arg12[%c1_57, %c192_58] : memref<2x256xf32, #tpu.memory_space<vmem>>, vector<1x32xf32>
    tpu.vector_store %arg12[%c1_57, %c192_58], %131 {strides = array<i32>} : memref<2x256xf32, #tpu.memory_space<vmem>>, vector<1x32xf32>,
    %133 = vector.extract_strided_slice %130 {offsets = [1, 0], sizes = [1, 32], strides = [1, 1]} : vector<2x32xf32> to vector<1x32xf32>
    %c1_59 = arith.constant 1 : index
    %c224_60 = arith.constant 224 : index
    %134 = vector.load %arg12[%c1_59, %c224_60] : memref<2x256xf32, #tpu.memory_space<vmem>>, vector<1x32xf32>
    tpu.vector_store %arg12[%c1_59, %c224_60], %133 {strides = array<i32>} : memref<2x256xf32, #tpu.memory_space<vmem>>, vector<1x32xf32>,
    %c0_61 = arith.constant 0 : index
    %c0_62 = arith.constant 0 : index
    %135 = vector.load %arg12[%c0_61, %c0_62] : memref<2x256xf32, #tpu.memory_space<vmem>>, vector<2x256xf32>
    %136 = arith.truncf %135 : vector<2x256xf32> to vector<2x256xbf16>
    %c0_63 = arith.constant 0 : index
    %c0_64 = arith.constant 0 : index
    %137 = vector.load %arg9[%c0_63, %c0_64] : memref<256x2xbf16, #tpu.memory_space<vmem>>, vector<256x2xbf16>
    %cst_65 = arith.constant dense<0.000000e+00> : vector<2x2xf32>
    %138 = tpu.matmul %136, %137, %cst_65 {dimension_numbers = #tpu.dot_dimension_numbers<[1], [0], [0], [1], [0, 0, 1, 1], [], []>} : vector<2x256xbf16>, vector<256x2xbf16>, vector<2x2xf32> -> vector<2x2xf32>
    %c0_66 = arith.constant 0 : index
    %c0_67 = arith.constant 0 : index
    %139 = vector.load %arg10[%c0_66, %c0_67] : memref<1x2xf32, #tpu.memory_space<vmem>>, vector<1x2xf32>
    %140 = vector.broadcast %139 : vector<1x2xf32> to vector<2x2xf32>
    %141 = arith.addf %138, %140 : vector<2x2xf32>
    %c0_68 = arith.constant 0 : index
    %c0_69 = arith.constant 0 : index
    %142 = vector.load %arg11[%c0_68, %c0_69] : memref<2x2xf32, #tpu.memory_space<vmem>>, vector<2x2xf32>
    tpu.vector_store %arg11[%c0_68, %c0_69], %141 {strides = array<i32>} : memref<2x2xf32, #tpu.memory_space<vmem>>, vector<2x2xf32>,
    return
  }
  func.func @transform_0(%arg0: i32) -> (i32, i32, i32) {
    %c0_i32 = arith.constant 0 : i32
    %c0_i32_0 = arith.constant 0 : i32
    %c0_i32_1 = arith.constant 0 : i32
    %c0_i32_2 = arith.constant 0 : i32
    return %c0_i32, %c0_i32_0, %c0_i32_1 : i32, i32, i32
  }
  func.func @transform_1(%arg0: i32) -> (i32, i32) {
    %c0_i32 = arith.constant 0 : i32
    %c0_i32_0 = arith.constant 0 : i32
    %c0_i32_1 = arith.constant 0 : i32
    return %c0_i32, %c0_i32_0 : i32, i32
  }
  func.func @transform_2(%arg0: i32) -> (i32, i32) {
    %c0_i32 = arith.constant 0 : i32
    %c0_i32_0 = arith.constant 0 : i32
    %c0_i32_1 = arith.constant 0 : i32
    return %c0_i32, %c0_i32_0 : i32, i32
  }
  func.func @transform_3(%arg0: i32) -> (i32, i32) {
    %c0_i32 = arith.constant 0 : i32
    %c0_i32_0 = arith.constant 0 : i32
    %c0_i32_1 = arith.constant 0 : i32
    return %c0_i32, %c0_i32_0 : i32, i32
  }
  func.func @transform_4(%arg0: i32) -> (i32, i32) {
    %c0_i32 = arith.constant 0 : i32
    %c0_i32_0 = arith.constant 0 : i32
    %c0_i32_1 = arith.constant 0 : i32
    return %c0_i32, %c0_i32_0 : i32, i32
  }
  func.func @transform_5(%arg0: i32) -> (i32, i32) {
    %c0_i32 = arith.constant 0 : i32
    %c0_i32_0 = arith.constant 0 : i32
    %c0_i32_1 = arith.constant 0 : i32
    return %c0_i32, %c0_i32_0 : i32, i32
  }
  func.func @transform_6(%arg0: i32) -> (i32, i32) {
    %c0_i32 = arith.constant 0 : i32
    %c0_i32_0 = arith.constant 0 : i32
    %c0_i32_1 = arith.constant 0 : i32
    return %c0_i32, %c0_i32_0 : i32, i32
  }
  func.func @transform_7(%arg0: i32) -> (i32, i32) {
    %c0_i32 = arith.constant 0 : i32
    %c0_i32_0 = arith.constant 0 : i32
    %c0_i32_1 = arith.constant 0 : i32
    return %c0_i32, %c0_i32_0 : i32, i32
  }
  func.func @transform_8(%arg0: i32) -> (i32, i32) {
    %c0_i32 = arith.constant 0 : i32
    %c0_i32_0 = arith.constant 0 : i32
    %c0_i32_1 = arith.constant 0 : i32
    return %c0_i32, %c0_i32_0 : i32, i32
  }
  func.func @transform_9(%arg0: i32) -> (i32, i32) {
    %c0_i32 = arith.constant 0 : i32
    %c0_i32_0 = arith.constant 0 : i32
    %c0_i32_1 = arith.constant 0 : i32
    return %c0_i32, %c0_i32_0 : i32, i32
  }
  func.func @transform_10(%arg0: i32) -> (i32, i32) {
    %c0_i32 = arith.constant 0 : i32
    %c0_i32_0 = arith.constant 0 : i32
    %c0_i32_1 = arith.constant 0 : i32
    return %c0_i32, %c0_i32_0 : i32, i32
  }
}

</mosaic_0001>

<bundles_post_ra>
// kernel: rnn_model_forward.1
= control target key start
LH: loop header
LB: loop body
LE: loop exit
PB: predicated region body
PF: predicated region fallthrough
CT: control target
= control target key end

     0   :  { %vm101_vm0 = vcmask 1043456   ;;  %s2715_s0 = inlined_call_operand.vmem [shape: f32[16,4,256], index: 0, kind: input, shape index: {}]   ;;  %s2716_s1 = inlined_call_operand.vmem [shape: bf16[4,128], index: 1, kind: input, shape index: {}]   ;;  %s2717_s2 = inlined_call_operand.vmem [shape: f32[1,128], index: 2, kind: input, shape index: {}]   ;;  %s2718_s3 = inlined_call_operand.vmem [shape: bf16[128,32], index: 3, kind: input, shape index: {}]   ;;  %s2719_s4 = inlined_call_operand.vmem [shape: bf16[32,32], index: 4, kind: input, shape index: {}]   ;;  %s2720_s5 = inlined_call_operand.vmem [shape: f32[1,32], index: 5, kind: input, shape index: {}]   ;;  %s2721_s6 = inlined_call_operand.vmem [shape: bf16[64,32], index: 6, kind: input, shape index: {}]   ;;  %s2722_s7 = inlined_call_operand.vmem [shape: f32[1,32], index: 7, kind: input, shape index: {}]   ;;  %s2723_s8 = inlined_call_operand.vmem [shape: bf16[256,2], index: 8, kind: input, shape index: {}]   ;;  %s2724_s9 = inlined_call_operand.vmem [shape: f32[1,2], index: 9, kind: input, shape index: {}]   ;;  %s2725_s10 = inlined_call_operand.hbm [shape: f32[2,2], index: 10, kind: output, shape index: {}]  }
   0x1   :  { %v45_v0 = vld [vmem:[%s2715_s0 + $0x40] sm:$0xff]  ;;  %v46_v2 = vld [vmem:[%s2715_s0 + $0x48] sm:$0xff]  ;;  %v47_v8 = vld [vmem:[%s2715_s0 + $0x50] sm:$0xff] }
   0x2   :  { %v37_v1 = vld [vmem:[%s2715_s0] sm:$0xff]  ;;  %v77_v3 = vcombine.high %v45_v0, %v45_v0  ;;  %v142_v4 = vsel %vm101_vm0, %v45_v0, 0.0  ;;  %v38_v7 = vld [vmem:[%s2715_s0 + $0x8] sm:$0xff]  ;;  %v78_v9 = vcombine.high %v46_v2, %v46_v2  ;;  %v147_v10 = vsel %vm101_vm0, %v46_v2, 0.0  ;;  %v39_v12 = vld [vmem:[%s2715_s0 + $0x10] sm:$0xff] }
   0x3   :  { %v69_v5 = vcombine.high %v37_v1, %v37_v1  ;;  %v102_v6 = vsel %vm101_vm0, %v37_v1, 0.0  ;;  %v70_v11 = vcombine.high %v38_v7, %v38_v7  ;;  %v107_v15 = vsel %vm101_vm0, %v38_v7, 0.0  ;;  %v48_v17 = vld [vmem:[%s2715_s0 + $0x58] sm:$0xff]  ;;  %v49_v23 = vld [vmem:[%s2715_s0 + $0x60] sm:$0xff]  ;;  %v50_v31 = vld [vmem:[%s2715_s0 + $0x68] sm:$0xff] }
   0x4   :  { %v143_v13 = vsel %vm101_vm0, %v77_v3, 0.0  ;;  %v79_v16 = vcombine.high %v47_v8, %v47_v8  ;;  %v148_v20 = vsel %vm101_vm0, %v78_v9, 0.0  ;;  %v40_v22 = vld [vmem:[%s2715_s0 + $0x18] sm:$0xff]  ;;  %v152_v24 = vsel %vm101_vm0, %v47_v8, 0.0  ;;  %v41_v26 = vld [vmem:[%s2715_s0 + $0x20] sm:$0xff]  ;;  %v42_v35 = vld [vmem:[%s2715_s0 + $0x28] sm:$0xff] }
   0x5   :  { %v103_v14 = vsel %vm101_vm0, %v69_v5, 0.0  ;;  %v144_v18 = vadd.f32 %v143_v13, %v142_v4  ;;  %v108_v21 = vsel %vm101_vm0, %v70_v11, 0.0  ;;  %v71_v25 = vcombine.high %v39_v12, %v39_v12  ;;  %v51_v36 = vld [vmem:[%s2715_s0 + $0x70] sm:$0xff]  ;;  %v52_v40 = vld [vmem:[%s2715_s0 + $0x78] sm:$0xff] }
   0x6   :  { %v104_v19 = vadd.f32 %v103_v14, %v102_v6  ;;  %v149_v27 = vadd.f32 %v148_v20, %v147_v10  ;;  %v109_v28 = vadd.f32 %v108_v21, %v107_v15  ;;  %v153_v29 = vsel %vm101_vm0, %v79_v16, 0.0  ;;  %v43_v39 = vld [vmem:[%s2715_s0 + $0x30] sm:$0xff]  ;;  %v44_v4 = vld [vmem:[%s2715_s0 + $0x38] sm:$0xff] }
   0x7   :  { %145 = vadd.xlane.f32.xlu1 %v144_v18  ;;  %v80_v30 = vcombine.high %v48_v17, %v48_v17  ;;  %v112_v32 = vsel %vm101_vm0, %v39_v12, 0.0  ;;  %v113_v33 = vsel %vm101_vm0, %v71_v25, 0.0  ;;  %v72_v34 = vcombine.high %v40_v22, %v40_v22 }
   0x8   :  { %105 = vadd.xlane.f32.xlu0 %v104_v19  ;;  %v154_v37 = vadd.f32 %v153_v29, %v152_v24  ;;  %v81_v38 = vcombine.high %v49_v23, %v49_v23  ;;  %v114_v41 = vadd.f32 %v113_v33, %v112_v32  ;;  %v157_v42 = vsel %vm101_vm0, %v48_v17, 0.0 }
   0x9   :  { %v158_v43 = vsel %vm101_vm0, %v80_v30, 0.0  ;;  %v73_v44 = vcombine.high %v41_v26, %v41_v26  ;;  %v117_v45 = vsel %vm101_vm0, %v40_v22, 0.0  ;;  %v118_v46 = vsel %vm101_vm0, %v72_v34, 0.0 }
   0xa   :  { %v82_v47 = vcombine.high %v50_v31, %v50_v31  ;;  %v162_v48 = vsel %vm101_vm0, %v49_v23, 0.0  ;;  %v74_v49 = vcombine.high %v42_v35, %v42_v35  ;;  %v83_v50 = vcombine.high %v51_v36, %v51_v36 }
   0xb   :  { %150 = vadd.xlane.f32.xlu1 %v149_v27  ;;  %v75_v51 = vcombine.high %v43_v39, %v43_v39  ;;  %v159_v52 = vadd.f32 %v158_v43, %v157_v42  ;;  %v163_v53 = vsel %vm101_vm0, %v81_v38, 0.0  ;;  %v122_v54 = vsel %vm101_vm0, %v41_v26, 0.0 }
   0xc   :  { %110 = vadd.xlane.f32.xlu0 %v109_v28  ;;  %v84_v55 = vcombine.high %v52_v40, %v52_v40  ;;  %v119_v56 = vadd.f32 %v118_v46, %v117_v45  ;;  %v123_v57 = vsel %vm101_vm0, %v73_v44, 0.0  ;;  %v167_v58 = vsel %vm101_vm0, %v50_v31, 0.0 }
   0xd   :  { %v127_v59 = vsel %vm101_vm0, %v42_v35, 0.0  ;;  %v168_v60 = vsel %vm101_vm0, %v82_v47, 0.0  ;;  %v172_v61 = vsel %vm101_vm0, %v51_v36, 0.0  ;;  %v128_v62 = vsel %vm101_vm0, %v74_v49, 0.0 }
   0xe   :  { %v173_v63 = vsel %vm101_vm0, %v83_v50, 0.0  ;;  %v132_v0 = vsel %vm101_vm0, %v43_v39, 0.0  ;;  %v133_v1 = vsel %vm101_vm0, %v75_v51, 0.0  ;;  %v177_v2 = vsel %vm101_vm0, %v52_v40, 0.0 }
   0xf   :  { %155 = vadd.xlane.f32.xlu1 %v154_v37  ;;  %v178_v3 = vsel %vm101_vm0, %v84_v55, 0.0  ;;  %v164_v5 = vadd.f32 %v163_v53, %v162_v48  ;;  %v124_v6 = vadd.f32 %v123_v57, %v122_v54  ;;  %v169_v7 = vadd.f32 %v168_v60, %v167_v58 }
  0x10   :  { %115 = vadd.xlane.f32.xlu0 %v114_v41  ;;  %v129_v8 = vadd.f32 %v128_v62, %v127_v59  ;;  %v76_v9 = vcombine.high %v44_v4, %v44_v4  ;;  %v174_v10 = vadd.f32 %v173_v63, %v172_v61  ;;  %v134_v11 = vadd.f32 %v133_v1, %v132_v0 }
  0x11   :  { %v137_v12 = vsel %vm101_vm0, %v44_v4, 0.0  ;;  %v179_v14 = vadd.f32 %v178_v3, %v177_v2 }
  0x12   :  { %v138_v13 = vsel %vm101_vm0, %v76_v9, 0.0 }
  0x13   :  { %160 = vadd.xlane.f32.xlu1 %v159_v52  ;;  %v139_v15 = vadd.f32 %v138_v13, %v137_v12 }
  0x14   :  { %120 = vadd.xlane.f32.xlu0 %v119_v56 }
  0x17   :  { %165 = vadd.xlane.f32.xlu1 %v164_v5 }
  0x18   :  { %125 = vadd.xlane.f32.xlu0 %v124_v6 }
  0x1b   :  { %170 = vadd.xlane.f32.xlu1 %v169_v7 }
  0x1c   :  { %130 = vadd.xlane.f32.xlu0 %v129_v8 }
  0x1f   :  { %175 = vadd.xlane.f32.xlu1 %v174_v10 }
  0x20   :  { %135 = vadd.xlane.f32.xlu0 %v134_v11 }
  0x21   :  { %15 = vsyncpa [#allocation4], 0  ;;  %v215_v16 = vld [vmem:[%s2716_s1] sm:$0x3]  ;;  %vm347_vm1 = vcmask 1041408   ;;  %v2157_v17 = vmov 0.0   ;;  %v255_v32 = vlaneseq }
  0x22   :  { %1861 = vmatprep.subr.bf16.mxu0 %v2157_v17  ;;  %v349_v18 = vsel %vm347_vm1, %v215_v16, 0  ;;  %1867 = vmatprep.subr.bf16.mxu1 %v2157_v17  ;;  %vm2158_vm2 = vmmov 0   ;;  %v2071_v19 = vld [vmem:[%s2718_s3] sm:$0xff]   ;;  %v2072_v20 = vld [vmem:[%s2718_s3 + $0x8] sm:$0xff]   ;;  %v2073_v21 = vld [vmem:[%s2718_s3 + $0x10] sm:$0xff]   ;;  %vm321_vm3 = vcmask 1041409  }
  0x23   :  { %180 = vadd.xlane.f32.xlu1 %v179_v14  ;;  %1862 = vmatpush3.bf16.msra.mxu0 %v349_v18  ;;  %v2074_v22 = vld [vmem:[%s2718_s3 + $0x18] sm:$0xff]   ;;  %v2075_v23 = vld [vmem:[%s2718_s3 + $0x20] sm:$0xff]   ;;  %v2076_v24 = vld [vmem:[%s2718_s3 + $0x28] sm:$0xff]   ;;  %v256_v39 = vand.u32 127, %v255_v32  ;;  %v2338_v40 = vshrl.u32 %v255_v32, 7  ;;  %vm323_vm4 = vcmask 1042434  }
  0x24   :  { %140 = vadd.xlane.f32.xlu0 %v139_v15  ;;  %1863 = vmatprep.mubr.msk.bf16.mxu0 %vm2158_vm2, %v2157_v17  ;;  %v2077_v25 = vld [vmem:[%s2718_s3 + $0x30] sm:$0xff]   ;;  %vm325_vm5 = vcmask 1043459   ;;  %vm327_vm6 = vcmask 1044484   ;;  %vm329_vm7 = vcmask 1045509   ;;  %vm331_vm8 = vcmask 1046534   ;;  %s2162_s12 = smov 64  }
  0x25   :  { %1883 = vmatprep.mubr.msk.bf16.mxu1 %vm2158_vm2, %v2157_v17  ;;  %1895 = vmatprep.subr.bf16.mxu0 %v2157_v17  ;;  %v2341_v53 = vsub.s32 %v256_v39, %v2338_v40  ;;  %vm333_vm9 = vcmask 1047559   ;;  %vm343_vm10 = vcmask 31744   ;;  %vm536_vm11 = vcmask 261120   ;;  %s2163_s13 = smov 96  }
  0x26   :  { %1868 = vmatpush3.bf16.msra.mxu1 %v2071_v19  ;;  %vm608_vm12 = vcmask 523264   ;;  %vm653_vm13 = vcmask 253952   ;;  %vm668_vm14 = vcmask 516352   ;;  %vm782_vm15 = vcmask 778752  }
  0x27   :  { %1869 = vmatprep.subr.bf16.mxu1 %v2157_v17  ;;  %vm789_vm0 = vcmask 1041152   ;;  %vm1689_vm1 = vcmask 9216  }
  0x2a   :  { %1870 = vmatpush3.bf16.msra.mxu1 %v2072_v20 }
  0x2b   :  { %1871 = vmatprep.subr.bf16.mxu1 %v2157_v17 }
  0x2e   :  { %1872 = vmatpush3.bf16.msra.mxu1 %v2073_v21 }
  0x2f   :  { %1873 = vmatprep.subr.bf16.mxu1 %v2157_v17 }
  0x32   :  { %1874 = vmatpush3.bf16.msra.mxu1 %v2074_v22 }
  0x33   :  { %1875 = vmatprep.subr.bf16.mxu1 %v2157_v17 }
  0x36   :  { %1876 = vmatpush3.bf16.msra.mxu1 %v2075_v23 }
  0x37   :  { %1877 = vmatprep.subr.bf16.mxu1 %v2157_v17 }
  0x3a   :  { %1878 = vmatpush3.bf16.msra.mxu1 %v2076_v24 }
  0x3b   :  { %1879 = vmatprep.subr.bf16.mxu1 %v2157_v17 }
  0x3e   :  { %1880 = vmatpush3.bf16.msra.mxu1 %v2077_v25 }
  0x3f   :  { %1881 = vmatprep.subr.bf16.mxu1 %v2157_v17 }
  0x94   :  { %v146_v26 = vpop.xlane.xlu1 %145 }
  0x95   :  { %v106_v27 = vpop.xlane.xlu0 %105  ;;  %v191_v35 = vmul.f32 0.00390625, %v146_v26 }
  0x96   :  { %v183_v36 = vmul.f32 0.00390625, %v106_v27 }
  0x97   :  { %v207_v43 = vpack.c.bf16 %v191_v35, %v191_v35 }
  0x98   :  { %v151_v28 = vpop.xlane.xlu1 %150  ;;  %v199_v44 = vpack.c.bf16 %v183_v36, %v183_v36 }
  0x99   :  { %v111_v29 = vpop.xlane.xlu0 %110  ;;  %v192_v33 = vmul.f32 0.00390625, %v151_v28  ;;  %v247_v56 = vunpack.c.l.b16 %v207_v43 }
  0x9a   :  { %v184_v34 = vmul.f32 0.00390625, %v111_v29  ;;  %v239_v57 = vunpack.c.l.b16 %v199_v44 }
  0x9b   :  { %v208_v41 = vpack.c.bf16 %v192_v33, %v192_v33  ;;  %v292_v12 = vrot.slane %v247_v56, %v2341_v53 }
  0x9c   :  { %v156_v30 = vpop.xlane.xlu1 %155  ;;  %v200_v42 = vpack.c.bf16 %v184_v34, %v184_v34  ;;  %v260_v13 = vrot.slane %v239_v57, %v2341_v53 }
  0x9d   :  { %v116_v31 = vpop.xlane.xlu0 %115  ;;  %v193_v45 = vmul.f32 0.00390625, %v156_v30  ;;  %v248_v54 = vunpack.c.l.b16 %v208_v41 }
  0x9e   :  { %v185_v46 = vmul.f32 0.00390625, %v116_v31  ;;  %v240_v55 = vunpack.c.l.b16 %v200_v42 }
  0x9f   :  { %v209_v58 = vpack.c.bf16 %v193_v45, %v193_v45  ;;  %v296_v4 = vrot.slane %v248_v54, %v2341_v53 }
  0xa0   :  { %v161_v37 = vpop.xlane.xlu1 %160  ;;  %v201_v59 = vpack.c.bf16 %v185_v46, %v185_v46  ;;  %v264_v5 = vrot.slane %v240_v55, %v2341_v53 }
  0xa1   :  { %v121_v38 = vpop.xlane.xlu0 %120  ;;  %v194_v49 = vmul.f32 0.00390625, %v161_v37  ;;  %v249_v8 = vunpack.c.l.b16 %v209_v58  ;;  %v335_v21 = vsel %vm321_vm3, %v296_v4, %v292_v12  ;;  %v2410_v12 = vld [vmem:[%s2721_s6 + $0x8] sm:$0xff]  }
  0xa2   :  { %v186_v50 = vmul.f32 0.00390625, %v121_v38  ;;  %v241_v9 = vunpack.c.l.b16 %v201_v59  ;;  %v322_v22 = vsel %vm321_vm3, %v264_v5, %v260_v13  ;;  %v2419_v13 = vld [vmem:[%s2721_s6 + $0x10] sm:$0xff]  }
  0xa3   :  { %v210_v62 = vpack.c.bf16 %v194_v49, %v194_v49  ;;  %v300_v25 = vrot.slane %v249_v8, %v2341_v53 }
  0xa4   :  { %v166_v47 = vpop.xlane.xlu1 %165  ;;  %v202_v63 = vpack.c.bf16 %v186_v50, %v186_v50  ;;  %v268_v26 = vrot.slane %v241_v9, %v2341_v53  ;;  %v2389_v9 = vld [vmem:[%s2719_s4 + $0x8] sm:$0xff]  }
  0xa5   :  { %v126_v48 = vpop.xlane.xlu0 %125  ;;  %v195_v51 = vmul.f32 0.00390625, %v166_v47  ;;  %v250_v14 = vunpack.c.l.b16 %v210_v62  ;;  %v336_v44 = vsel %vm323_vm4, %v300_v25, %v335_v21 }
  0xa6   :  { %v187_v52 = vmul.f32 0.00390625, %v126_v48  ;;  %v242_v15 = vunpack.c.l.b16 %v202_v63  ;;  %v324_v45 = vsel %vm323_vm4, %v268_v26, %v322_v22 }
  0xa7   :  { %v211_v2 = vpack.c.bf16 %v195_v51, %v195_v51  ;;  %v304_v31 = vrot.slane %v250_v14, %v2341_v53  ;;  %v2428_v14 = vld [vmem:[%s2721_s6 + $0x18] sm:$0xff]  }
  0xa8   :  { %v171_v60 = vpop.xlane.xlu1 %170  ;;  %v203_v3 = vpack.c.bf16 %v187_v52, %v187_v52  ;;  %v272_v32 = vrot.slane %v242_v15, %v2341_v53 }
  0xa9   :  { %v131_v61 = vpop.xlane.xlu0 %130  ;;  %v196_v0 = vmul.f32 0.00390625, %v171_v60  ;;  %v251_v16 = vunpack.c.l.b16 %v211_v2  ;;  %v337_v48 = vsel %vm325_vm5, %v304_v31, %v336_v44 }
  0xaa   :  { %v188_v1 = vmul.f32 0.00390625, %v131_v61  ;;  %v243_v18 = vunpack.c.l.b16 %v203_v3  ;;  %v326_v49 = vsel %vm325_vm5, %v272_v32, %v324_v45  ;;  %v2460_v32 = vld [vmem:[%s2722_s7] ss:$0 sm:$0xff]  ;;  %s2160_s7 = smov 32  }
  0xab   :  { %v212_v6 = vpack.c.bf16 %v196_v0, %v196_v0  ;;  %v308_v35 = vrot.slane %v251_v16, %v2341_v53  ;;  %v2078_v0 = vld [vmem:[%s2718_s3 + $0x38] sm:$0xff]  }
  0xac   :  { %v204_v7 = vpack.c.bf16 %v188_v1, %v188_v1  ;;  %v176_v10 = vpop.xlane.xlu1 %175  ;;  %v276_v36 = vrot.slane %v243_v18, %v2341_v53  ;;  %1882 = vmatpush3.bf16.msra.mxu1 %v2078_v0  ;;  %v1707_v18 = vld [vmem:[%s2720_s5] ss:$0 sm:$0xff] }
  0xad   :  { %v136_v11 = vpop.xlane.xlu0 %135  ;;  %v197_v19 = vmul.f32 0.00390625, %v176_v10  ;;  %v252_v23 = vunpack.c.l.b16 %v212_v6  ;;  %v338_v52 = vsel %vm327_vm6, %v308_v35, %v337_v48  ;;  %1887 = vmatprep.subr.bf16.mxu1 %v2157_v17  ;;  %v2159_v10 = vmov 0  }
  0xae   :  { %v189_v20 = vmul.f32 0.00390625, %v136_v11  ;;  %v244_v24 = vunpack.c.l.b16 %v204_v7  ;;  %v328_v54 = vsel %vm327_vm6, %v276_v36, %v326_v49  ;;  %v2383_v7 = vld [vmem:[%s2719_s4] sm:$0xff]  }
  0xaf   :  { %v213_v27 = vpack.c.bf16 %v197_v19, %v197_v19  ;;  %v312_v39 = vrot.slane %v252_v23, %v2341_v53  ;;  %v2401_v11 = vld [vmem:[%s2721_s6] sm:$0xff]  }
  0xb0   :  { %v205_v28 = vpack.c.bf16 %v189_v20, %v189_v20  ;;  %v181_v29 = vpop.xlane.xlu1 %180  ;;  %v280_v41 = vrot.slane %v244_v24, %v2341_v53 }
  0xb1   :  { %v141_v30 = vpop.xlane.xlu0 %140  ;;  %v198_v33 = vmul.f32 0.00390625, %v181_v29  ;;  %v253_v37 = vunpack.c.l.b16 %v213_v27  ;;  %v339_v55 = vsel %vm329_vm7, %v312_v39, %v338_v52 }
  0xb2   :  { %v190_v34 = vmul.f32 0.00390625, %v141_v30  ;;  %v245_v38 = vunpack.c.l.b16 %v205_v28  ;;  %v330_v56 = vsel %vm329_vm7, %v280_v41, %v328_v54 }
  0xb3   :  { %v214_v42 = vpack.c.bf16 %v198_v33, %v198_v33  ;;  %v316_v46 = vrot.slane %v253_v37, %v2341_v53 }
  0xb4   :  { %v206_v43 = vpack.c.bf16 %v190_v34, %v190_v34  ;;  %v284_v47 = vrot.slane %v245_v38, %v2341_v53 }
  0xb5   :  { %v254_v50 = vunpack.c.l.b16 %v214_v42  ;;  %v340_v59 = vsel %vm331_vm8, %v316_v46, %v339_v55 }
  0xb6   :  { %v246_v51 = vunpack.c.l.b16 %v206_v43  ;;  %v332_v60 = vsel %vm331_vm8, %v284_v47, %v330_v56 }
  0xb7   :  { %v320_v57 = vrot.slane %v254_v50, %v2341_v53 }
  0xb8   :  { %v288_v58 = vrot.slane %v246_v51, %v2341_v53  ;;  %v1705_v53 = vld [vmem:[%s2717_s2] ss:$0 sm:$0xff] }
  0xb9   :  { %v341_v61 = vsel %vm333_vm9, %v320_v57, %v340_v59 }
  0xba   :  { %v334_v62 = vsel %vm333_vm9, %v288_v58, %v332_v60 }
  0xbb   :  { %v342_v63 = vpack.c.b16 %v341_v61, %v334_v62 }
  0xbd   :  { %1864 = vmatmul.mubr.msk.bf16.vlgmr.msra.gmra.mrb[0].mxu0 %vm343_vm10, %v342_v63 }
  0xbe   :  { %1903 = vmatprep.mubr.msk.bf16.mxu0 %vm2158_vm2, %v2157_v17  ;;  %1896 = vmatpush3.bf16.msra.mxu0 %v2401_v11 }
  0xbf   :  { %1897 = vmatprep.subr.bf16.mxu0 %v2157_v17 }
  0xc2   :  { %1898 = vmatpush3.bf16.msra.mxu0 %v2410_v12 }
  0xc3   :  { %1899 = vmatprep.subr.bf16.mxu0 %v2157_v17 }
  0xc6   :  { %1900 = vmatpush3.bf16.msra.mxu0 %v2419_v13 }
  0xc7   :  { %1901 = vmatprep.subr.bf16.mxu0 %v2157_v17 }
  0xca   :  { %1902 = vmatpush3.bf16.msra.mxu0 %v2428_v14 }
  0xcb   :  { %1907 = vmatprep.subr.bf16.mxu0 %v2157_v17 }
 0x190   :  { %v385_v1 = vpop.f32.mrb[0].mxu0 }
 0x191   :  { %v1865_v2 = vpop.f32.mrb[1].mxu0  ;;  %v386_v4 = vadd.f32 %v1705_v53, %v385_v1 }
 0x192   :  { %v388_v3 = vpop.f32.mrb[2].mxu0 }
 0x193   :  { %v389_v5 = vadd.f32 %v1705_v53, %v388_v3  ;;  %v1866_v6 = vpop.f32.mrb[3].mxu0 }
 0x195   :  { %v392_v8 = vpack.c.bf16 %v389_v5, %v386_v4 }
 0x197   :  { %1884 = vmatmul.mubr.bf16.vlgmr.msra.gmra.mrb[0].mxu1 %v392_v8 }
 0x198   :  { %1888 = vmatpush3.bf16.msra.mxu1 %v2383_v7  ;;  %1891 = vmatprep.mubr.msk.bf16.mxu1 %vm2158_vm2, %v2157_v17 }
 0x199   :  { %1889 = vmatprep.subr.bf16.mxu1 %v2157_v17 }
 0x19c   :  { %1890 = vmatpush3.bf16.msra.mxu1 %v2389_v9 }
 0x19d   :  { %1915 = vmatprep.subr.bf16.mxu1 %v2157_v17 }
 0x19f   :  { %1892 = vmatmul.mubr.bf16.vlgmr.msra.gmra.mrb[4].mxu1 %v2159_v10 }
 0x1a0   :  { %1923 = vmatprep.mubr.msk.bf16.mxu1 %vm2158_vm2, %v2157_v17  ;;  %1916 = vmatpush3.bf16.msra.mxu1 %v2401_v11 }
 0x1a1   :  { %1917 = vmatprep.subr.bf16.mxu1 %v2157_v17 }
 0x1a4   :  { %1918 = vmatpush3.bf16.msra.mxu1 %v2410_v12 }
 0x1a5   :  { %1919 = vmatprep.subr.bf16.mxu1 %v2157_v17 }
 0x1a8   :  { %1920 = vmatpush3.bf16.msra.mxu1 %v2419_v13 }
 0x1a9   :  { %1921 = vmatprep.subr.bf16.mxu1 %v2157_v17 }
 0x1ac   :  { %1922 = vmatpush3.bf16.msra.mxu1 %v2428_v14 }
 0x1ad   :  { %1947 = vmatprep.subr.bf16.mxu1 %v2157_v17 }
 0x26a   :  { %v498_v15 = vpop.f32.mrb[0].mxu1 }
 0x26b   :  { %v1885_v16 = vpop.f32.mrb[1].mxu1  ;;  %v2439_v22 = vadd.f32 %v1707_v18, %v498_v15 }
 0x26c   :  { %v501_v19 = vpop.f32.mrb[2].mxu1 }
 0x26d   :  { %v2437_v20 = vadd.f32 %v1707_v18, %v501_v19  ;;  %v1886_v21 = vpop.f32.mrb[3].mxu1 }
 0x272   :  { %v574_v23 = vpop.f32.mrb[4].mxu1 }
 0x273   :  { %v580_v24 = vadd.f32 %v574_v23, %v2439_v22  ;;  %v1893_v25 = vpop.f32.mrb[5].mxu1 }
 0x274   :  { %v577_v26 = vpop.f32.mrb[6].mxu1 }
 0x275   :  { %2101 = vtanh.f32 %v580_v24  ;;  %v1894_v27 = vpop.f32.mrb[7].mxu1 }
 0x27f   :  { %v2102_v28 = vpop.eup %2101 }
 0x280   :  { %v582_v29 = vsel %vm536_vm11, %v2102_v28, 0.0  ;;  %v670_v31 = vpack.c.bf16 %v2102_v28, %v2102_v28 }
 0x281   :  { %v583_v30 = vpack.c.bf16 %v582_v29, %v582_v29 }
 0x283   :  { %1904 = vmatmul.mubr.msk.bf16.vlgmr.msra.gmra.mrb[4].mxu0 %vm608_vm12, %v583_v30 }
 0x284   :  { %1908 = vmatpush3.bf16.msra.mxu0 %v2383_v7  ;;  %1911 = vmatprep.mubr.msk.bf16.mxu0 %vm2158_vm2, %v2157_v17 }
 0x285   :  { %1909 = vmatprep.subr.bf16.mxu0 %v2157_v17 }
 0x288   :  { %1910 = vmatpush3.bf16.msra.mxu0 %v2389_v9 }
 0x289   :  { %1927 = vmatprep.subr.bf16.mxu0 %v2157_v17 }
 0x28b   :  { %1912 = vmatmul.mubr.msk.bf16.vlgmr.msra.gmra.mrb[8].mxu0 %vm536_vm11, %v670_v31 }
 0x28c   :  { %1928 = vmatpush3.bf16.msra.mxu0 %v2383_v7  ;;  %1931 = vmatprep.mubr.msk.bf16.mxu0 %vm2158_vm2, %v2157_v17 }
 0x28d   :  { %1929 = vmatprep.subr.bf16.mxu0 %v2157_v17 }
 0x290   :  { %1930 = vmatpush3.bf16.msra.mxu0 %v2389_v9 }
 0x291   :  { %1935 = vmatprep.subr.bf16.mxu0 %v2157_v17 }
 0x356   :  { %v646_v33 = vpop.f32.mrb[4].mxu0 }
 0x357   :  { %v647_v34 = vadd.f32 %v2460_v32, %v646_v33  ;;  %v1905_v35 = vpop.f32.mrb[5].mxu0 }
 0x358   :  { %v649_v36 = vpop.f32.mrb[6].mxu0 }
 0x359   :  { %2103 = vtanh.f32 %v647_v34  ;;  %v1906_v37 = vpop.f32.mrb[7].mxu0 }
 0x35e   :  { %v708_v38 = vpop.f32.mrb[8].mxu0 }
 0x35f   :  { %v715_v39 = vrot.slane %v708_v38, 6  ;;  %v1913_v41 = vpop.f32.mrb[9].mxu0 }
 0x360   :  { %v711_v42 = vpop.f32.mrb[10].mxu0 }
 0x361   :  { %v717_v43 = vadd.f32 %v715_v39, %v2439_v22  ;;  %v1914_v44 = vpop.f32.mrb[11].mxu0 }
 0x363   :  { %v2464_v45 = vpop.eup %2103  ;;  %2105 = vtanh.f32 %v717_v43 }
 0x364   :  { %v719_v46 = vrot.slane %v2464_v45, 6  ;;  %654 = vst.msk [vmem:[#allocation2] sm:$0x1] %vm653_vm13, %v2464_v45 }
 0x366   :  { %720 = vrot.lane.b32.xlu0 %v719_v46, %s2160_s7 }
 0x36d   :  { %v2106_v47 = vpop.eup %2105 }
 0x36e   :  { %v791_v48 = vpack.c.bf16 %v2106_v47, %v2106_v47 }
 0x370   :  { %v793_v49 = vrot.slane %v791_v48, 1 }
 0x372   :  { %1932 = vmatmul.mubr.msk.bf16.vlgmr.msra.gmra.mrb[12].mxu0 %vm536_vm11, %v793_v49 }
 0x373   :  { %1936 = vmatpush3.bf16.msra.mxu0 %v2401_v11  ;;  %1943 = vmatprep.mubr.msk.bf16.mxu0 %vm2158_vm2, %v2157_v17 }
 0x374   :  { %1937 = vmatprep.subr.bf16.mxu0 %v2157_v17 }
 0x377   :  { %1938 = vmatpush3.bf16.msra.mxu0 %v2410_v12 }
 0x378   :  { %1939 = vmatprep.subr.bf16.mxu0 %v2157_v17 }
 0x37b   :  { %1940 = vmatpush3.bf16.msra.mxu0 %v2419_v13 }
 0x37c   :  { %1941 = vmatprep.subr.bf16.mxu0 %v2157_v17 }
 0x37f   :  { %1942 = vmatpush3.bf16.msra.mxu0 %v2428_v14 }
 0x380   :  { %1967 = vmatprep.subr.bf16.mxu0 %v2157_v17 }
 0x3d8   :  { %v721_v50 = vpop.permute.xlu0 %720 }
 0x3d9   :  { %v723_v51 = vsel %vm536_vm11, %v2106_v47, %v721_v50 }
 0x3da   :  { %v724_v52 = vpack.c.bf16 %v723_v51, %v723_v51 }
 0x3dc   :  { %v726_v54 = vrot.slane %v724_v52, 1 }
 0x3de   :  { %1924 = vmatmul.mubr.msk.bf16.vlgmr.msra.gmra.mrb[8].mxu1 %vm608_vm12, %v726_v54 }
 0x3df   :  { %1948 = vmatpush3.bf16.msra.mxu1 %v2383_v7  ;;  %1951 = vmatprep.mubr.msk.bf16.mxu1 %vm2158_vm2, %v2157_v17 }
 0x3e0   :  { %1949 = vmatprep.subr.bf16.mxu1 %v2157_v17 }
 0x3e3   :  { %1950 = vmatpush3.bf16.msra.mxu1 %v2389_v9 }
 0x3e4   :  { %1955 = vmatprep.subr.bf16.mxu1 %v2157_v17 }
 0x445   :  { %v831_v55 = vpop.f32.mrb[12].mxu0 }
 0x446   :  { %v838_v56 = vrot.slane %v831_v55, 4  ;;  %v1933_v57 = vpop.f32.mrb[13].mxu0 }
 0x447   :  { %v834_v58 = vpop.f32.mrb[14].mxu0 }
 0x448   :  { %v840_v59 = vadd.f32 %v838_v56, %v2439_v22  ;;  %v1934_v60 = vpop.f32.mrb[15].mxu0 }
 0x44a   :  { %2107 = vtanh.f32 %v840_v59 }
 0x454   :  { %v2108_v61 = vpop.eup %2107 }
 0x455   :  { %v909_v62 = vpack.c.bf16 %v2108_v61, %v2108_v61 }
 0x457   :  { %v911_v63 = vrot.slane %v909_v62, 2 }
 0x459   :  { %1952 = vmatmul.mubr.msk.bf16.vlgmr.msra.gmra.mrb[12].mxu1 %vm536_vm11, %v911_v63 }
 0x45a   :  { %1956 = vmatpush3.bf16.msra.mxu1 %v2401_v11  ;;  %1963 = vmatprep.mubr.msk.bf16.mxu1 %vm2158_vm2, %v2157_v17 }
 0x45b   :  { %1957 = vmatprep.subr.bf16.mxu1 %v2157_v17 }
 0x45e   :  { %1958 = vmatpush3.bf16.msra.mxu1 %v2410_v12 }
 0x45f   :  { %1959 = vmatprep.subr.bf16.mxu1 %v2157_v17 }
 0x462   :  { %1960 = vmatpush3.bf16.msra.mxu1 %v2419_v13 }
 0x463   :  { %1961 = vmatprep.subr.bf16.mxu1 %v2157_v17 }
 0x466   :  { %1962 = vmatpush3.bf16.msra.mxu1 %v2428_v14 }
 0x467   :  { %1987 = vmatprep.subr.bf16.mxu1 %v2157_v17 }
 0x4b1   :  { %v764_v0 = vpop.f32.mrb[8].mxu1 }
 0x4b2   :  { %v765_v53 = vadd.f32 %v2460_v32, %v764_v0  ;;  %v1925_v1 = vpop.f32.mrb[9].mxu1 }
 0x4b3   :  { %v767_v2 = vpop.f32.mrb[10].mxu1 }
 0x4b4   :  { %2109 = vtanh.f32 %v765_v53  ;;  %v1926_v3 = vpop.f32.mrb[11].mxu1 }
 0x4be   :  { %v2502_v4 = vpop.eup %2109 }
 0x4bf   :  { %v842_v5 = vrot.slane %v2502_v4, 4 }
 0x4c1   :  { %843 = vrot.lane.b32.xlu1 %v842_v5, %s2160_s7 }
 0x52c   :  { %v949_v6 = vpop.f32.mrb[12].mxu1 }
 0x52d   :  { %v956_v8 = vrot.slane %v949_v6, 2  ;;  %v1953_v10 = vpop.f32.mrb[13].mxu1 }
 0x52e   :  { %v952_v15 = vpop.f32.mrb[14].mxu1 }
 0x52f   :  { %v958_v16 = vadd.f32 %v956_v8, %v2439_v22  ;;  %v1954_v18 = vpop.f32.mrb[15].mxu1 }
 0x531   :  { %2111 = vtanh.f32 %v958_v16 }
 0x533   :  { %v844_v19 = vpop.permute.xlu1 %843 }
 0x534   :  { %v846_v21 = vsel %vm536_vm11, %v2108_v61, %v844_v19 }
 0x535   :  { %v847_v23 = vpack.c.bf16 %v846_v21, %v846_v21 }
 0x537   :  { %v849_v24 = vrot.slane %v847_v23, 2 }
 0x539   :  { %1944 = vmatmul.mubr.msk.bf16.vlgmr.msra.gmra.mrb[16].mxu0 %vm608_vm12, %v849_v24 }
 0x53a   :  { %1968 = vmatpush3.bf16.msra.mxu0 %v2383_v7  ;;  %1971 = vmatprep.mubr.msk.bf16.mxu0 %vm2158_vm2, %v2157_v17 }
 0x53b   :  { %v2112_v25 = vpop.eup %2111  ;;  %1969 = vmatprep.subr.bf16.mxu0 %v2157_v17 }
 0x53c   :  { %v1030_v26 = vpack.c.bf16 %v2112_v25, %v2112_v25 }
 0x53e   :  { %1970 = vmatpush3.bf16.msra.mxu0 %v2389_v9  ;;  %v1032_v22 = vrot.slane %v1030_v26, 3 }
 0x53f   :  { %1975 = vmatprep.subr.bf16.mxu0 %v2157_v17 }
 0x541   :  { %1972 = vmatmul.mubr.msk.bf16.vlgmr.msra.gmra.mrb[20].mxu0 %vm536_vm11, %v1032_v22 }
 0x542   :  { %1976 = vmatpush3.bf16.msra.mxu0 %v2401_v11  ;;  %1983 = vmatprep.mubr.msk.bf16.mxu0 %vm2158_vm2, %v2157_v17 }
 0x543   :  { %1977 = vmatprep.subr.bf16.mxu0 %v2157_v17 }
 0x546   :  { %1978 = vmatpush3.bf16.msra.mxu0 %v2410_v12 }
 0x547   :  { %1979 = vmatprep.subr.bf16.mxu0 %v2157_v17 }
 0x54a   :  { %1980 = vmatpush3.bf16.msra.mxu0 %v2419_v13 }
 0x54b   :  { %1981 = vmatprep.subr.bf16.mxu0 %v2157_v17 }
 0x54e   :  { %1982 = vmatpush3.bf16.msra.mxu0 %v2428_v14 }
 0x54f   :  { %2007 = vmatprep.subr.bf16.mxu0 %v2157_v17 }
 0x60c   :  { %v887_v27 = vpop.f32.mrb[16].mxu0 }
 0x60d   :  { %v888_v28 = vadd.f32 %v2460_v32, %v887_v27  ;;  %v1945_v29 = vpop.f32.mrb[17].mxu0 }
 0x60e   :  { %v890_v30 = vpop.f32.mrb[18].mxu0 }
 0x60f   :  { %2113 = vtanh.f32 %v888_v28  ;;  %v1946_v31 = vpop.f32.mrb[19].mxu0 }
 0x614   :  { %v1070_v33 = vpop.f32.mrb[20].mxu0 }
 0x615   :  { %v1973_v34 = vpop.f32.mrb[21].mxu0  ;;  %v1076_v39 = vadd.f32 %v1070_v33, %v2437_v20  ;;  %v2161_v33 = vmov 1983009808  }
 0x616   :  { %v1073_v35 = vpop.f32.mrb[22].mxu0  ;;  %v657_v34 = vunpack.c.l.s4 %v2161_v33 }
 0x617   :  { %v1974_v36 = vpop.f32.mrb[23].mxu0  ;;  %2115 = vtanh.f32 %v1076_v39 }
 0x618   :  { %v658_v36 = vunpack.c.0.s8 %v657_v34 }
 0x619   :  { %v2527_v37 = vpop.eup %2113 }
 0x61a   :  { %v960_v38 = vrot.slane %v2527_v37, 2  ;;  %894 = vst.msk [vmem:[#allocation2 + $0x2] sm:$0x1] %vm653_vm13, %v2527_v37 }
 0x61c   :  { %961 = vrot.lane.b32.xlu1 %v960_v38, %s2160_s7 }
 0x621   :  { %v2116_v46 = vpop.eup %2115 }
 0x622   :  { %v1142_v47 = vpack.c.bf16 %v2116_v46, %v2116_v46 }
 0x68e   :  { %v962_v41 = vpop.permute.xlu1 %961 }
 0x68f   :  { %v964_v42 = vsel %vm536_vm11, %v2112_v25, %v962_v41 }
 0x690   :  { %v965_v43 = vpack.c.bf16 %v964_v42, %v964_v42 }
 0x692   :  { %v967_v44 = vrot.slane %v965_v43, 3 }
 0x694   :  { %1964 = vmatmul.mubr.msk.bf16.vlgmr.msra.gmra.mrb[16].mxu1 %vm608_vm12, %v967_v44 }
 0x695   :  { %1988 = vmatpush3.bf16.msra.mxu1 %v2383_v7  ;;  %1991 = vmatprep.mubr.msk.bf16.mxu1 %vm2158_vm2, %v2157_v17 }
 0x696   :  { %1989 = vmatprep.subr.bf16.mxu1 %v2157_v17 }
 0x699   :  { %1990 = vmatpush3.bf16.msra.mxu1 %v2389_v9 }
 0x69a   :  { %1995 = vmatprep.subr.bf16.mxu1 %v2157_v17 }
 0x69c   :  { %1992 = vmatmul.mubr.msk.bf16.vlgmr.msra.gmra.mrb[20].mxu1 %vm536_vm11, %v1142_v47 }
 0x69d   :  { %1996 = vmatpush3.bf16.msra.mxu1 %v2401_v11  ;;  %2003 = vmatprep.mubr.msk.bf16.mxu1 %vm2158_vm2, %v2157_v17 }
 0x69e   :  { %1997 = vmatprep.subr.bf16.mxu1 %v2157_v17 }
 0x6a1   :  { %1998 = vmatpush3.bf16.msra.mxu1 %v2410_v12 }
 0x6a2   :  { %1999 = vmatprep.subr.bf16.mxu1 %v2157_v17 }
 0x6a5   :  { %2000 = vmatpush3.bf16.msra.mxu1 %v2419_v13 }
 0x6a6   :  { %2001 = vmatprep.subr.bf16.mxu1 %v2157_v17 }
 0x6a9   :  { %2002 = vmatpush3.bf16.msra.mxu1 %v2428_v14 }
 0x6aa   :  { %2027 = vmatprep.subr.bf16.mxu1 %v2157_v17 }
 0x767   :  { %v1005_v48 = vpop.f32.mrb[16].mxu1 }
 0x768   :  { %v1006_v49 = vadd.f32 %v2460_v32, %v1005_v48  ;;  %v1965_v50 = vpop.f32.mrb[17].mxu1 }
 0x769   :  { %v1008_v51 = vpop.f32.mrb[18].mxu1 }
 0x76a   :  { %2117 = vtanh.f32 %v1006_v49  ;;  %v1966_v52 = vpop.f32.mrb[19].mxu1 }
 0x76f   :  { %v1180_v54 = vpop.f32.mrb[20].mxu1 }
 0x770   :  { %v1993_v55 = vpop.f32.mrb[21].mxu1  ;;  %v1187_v59 = vrot.slane %v1180_v54, 6 }
 0x771   :  { %v1183_v56 = vpop.f32.mrb[22].mxu1 }
 0x772   :  { %v1994_v57 = vpop.f32.mrb[23].mxu1  ;;  %v1189_v60 = vadd.f32 %v1187_v59, %v2437_v20 }
 0x774   :  { %v2554_v58 = vpop.eup %2117  ;;  %2119 = vtanh.f32 %v1189_v60 }
 0x775   :  { %1078 = vrot.lane.b32.xlu1 %v2554_v58, %s2160_s7 }
 0x77e   :  { %v2120_v0 = vpop.eup %2119 }
 0x77f   :  { %v1261_v53 = vpack.c.bf16 %v2120_v0, %v2120_v0 }
 0x781   :  { %v1263_v1 = vrot.slane %v1261_v53, 1 }
 0x7e7   :  { %v1079_v61 = vpop.permute.xlu1 %1078 }
 0x7e8   :  { %v1081_v62 = vsel %vm536_vm11, %v2116_v46, %v1079_v61 }
 0x7e9   :  { %v1082_v63 = vpack.c.bf16 %v1081_v62, %v1081_v62 }
 0x7eb   :  { %1984 = vmatmul.mubr.msk.bf16.vlgmr.msra.gmra.mrb[24].mxu0 %vm608_vm12, %v1082_v63 }
 0x7ec   :  { %2008 = vmatpush3.bf16.msra.mxu0 %v2383_v7  ;;  %2011 = vmatprep.mubr.msk.bf16.mxu0 %vm2158_vm2, %v2157_v17 }
 0x7ed   :  { %2009 = vmatprep.subr.bf16.mxu0 %v2157_v17 }
 0x7f0   :  { %2010 = vmatpush3.bf16.msra.mxu0 %v2389_v9 }
 0x7f1   :  { %2015 = vmatprep.subr.bf16.mxu0 %v2157_v17 }
 0x7f3   :  { %2012 = vmatmul.mubr.msk.bf16.vlgmr.msra.gmra.mrb[28].mxu0 %vm536_vm11, %v1263_v1 }
 0x7f4   :  { %2016 = vmatpush3.bf16.msra.mxu0 %v2401_v11  ;;  %2023 = vmatprep.mubr.msk.bf16.mxu0 %vm2158_vm2, %v2157_v17 }
 0x7f5   :  { %2017 = vmatprep.subr.bf16.mxu0 %v2157_v17 }
 0x7f8   :  { %2018 = vmatpush3.bf16.msra.mxu0 %v2410_v12 }
 0x7f9   :  { %2019 = vmatprep.subr.bf16.mxu0 %v2157_v17 }
 0x7fc   :  { %2020 = vmatpush3.bf16.msra.mxu0 %v2419_v13 }
 0x7fd   :  { %2021 = vmatprep.subr.bf16.mxu0 %v2157_v17 }
 0x800   :  { %2022 = vmatpush3.bf16.msra.mxu0 %v2428_v14 }
 0x8be   :  { %v1120_v2 = vpop.f32.mrb[24].mxu0 }
 0x8bf   :  { %v1121_v3 = vadd.f32 %v2460_v32, %v1120_v2  ;;  %v1985_v5 = vpop.f32.mrb[25].mxu0 }
 0x8c0   :  { %v1123_v6 = vpop.f32.mrb[26].mxu0 }
 0x8c1   :  { %2121 = vtanh.f32 %v1121_v3  ;;  %v1986_v8 = vpop.f32.mrb[27].mxu0 }
 0x8c6   :  { %v1301_v10 = vpop.f32.mrb[28].mxu0 }
 0x8c7   :  { %v2013_v15 = vpop.f32.mrb[29].mxu0  ;;  %v1308_v23 = vrot.slane %v1301_v10, 4 }
 0x8c8   :  { %v1304_v16 = vpop.f32.mrb[30].mxu0 }
 0x8c9   :  { %v2014_v18 = vpop.f32.mrb[31].mxu0  ;;  %v1310_v24 = vadd.f32 %v1308_v23, %v2437_v20 }
 0x8cb   :  { %v2122_v19 = vpop.eup %2121  ;;  %2123 = vtanh.f32 %v1310_v24 }
 0x8cc   :  { %v1191_v21 = vrot.slane %v2122_v19, 6  ;;  %1127 = vst.msk [vmem:[#allocation2 + $0x1] sm:$0x1] %vm653_vm13, %v2122_v19 }
 0x8ce   :  { %1192 = vrot.lane.b32.xlu0 %v1191_v21, %s2160_s7 }
 0x8d5   :  { %v2124_v28 = vpop.eup %2123 }
 0x8d6   :  { %v1379_v29 = vpack.c.bf16 %v2124_v28, %v2124_v28 }
 0x8d8   :  { %v1381_v30 = vrot.slane %v1379_v29, 2  ;;  %v2089_v29 = vld [vmem:[%s2723_s8 + $0x50] sm:$0xff]  }
 0x940   :  { %v1193_v25 = vpop.permute.xlu0 %1192 }
 0x941   :  { %v1195_v26 = vsel %vm536_vm11, %v2120_v0, %v1193_v25 }
 0x942   :  { %v1196_v22 = vpack.c.bf16 %v1195_v26, %v1195_v26 }
 0x944   :  { %v1198_v27 = vrot.slane %v1196_v22, 1  ;;  %v2086_v22 = vld [vmem:[%s2723_s8] sm:$0xff]  }
 0x946   :  { %2004 = vmatmul.mubr.msk.bf16.vlgmr.msra.gmra.mrb[24].mxu1 %vm608_vm12, %v1198_v27  ;;  %v2087_v27 = vld [vmem:[%s2723_s8 + $0x48] sm:$0xff]  }
 0x947   :  { %2028 = vmatpush3.bf16.msra.mxu1 %v2383_v7  ;;  %2031 = vmatprep.mubr.msk.bf16.mxu1 %vm2158_vm2, %v2157_v17 }
 0x948   :  { %2029 = vmatprep.subr.bf16.mxu1 %v2157_v17 }
 0x94b   :  { %2030 = vmatpush3.bf16.msra.mxu1 %v2389_v9 }
 0x94c   :  { %2035 = vmatprep.subr.bf16.mxu1 %v2157_v17 }
 0x94e   :  { %2032 = vmatmul.mubr.msk.bf16.vlgmr.msra.gmra.mrb[28].mxu1 %vm536_vm11, %v1381_v30  ;;  %v2090_v30 = vld [vmem:[%s2723_s8 + $0x10] sm:$0xff]  }
 0x94f   :  { %2036 = vmatpush3.bf16.msra.mxu1 %v2401_v11  ;;  %2043 = vmatprep.mubr.msk.bf16.mxu1 %vm2158_vm2, %v2157_v17 }
 0x950   :  { %2037 = vmatprep.subr.bf16.mxu1 %v2157_v17 }
 0x953   :  { %2038 = vmatpush3.bf16.msra.mxu1 %v2410_v12 }
 0x954   :  { %2039 = vmatprep.subr.bf16.mxu1 %v2157_v17 }
 0x957   :  { %2040 = vmatpush3.bf16.msra.mxu1 %v2419_v13  ;;  %v2603_v13 = vsub.s32 %v658_v36, %v2338_v40  ;;  %v2093_v36 = vld [vmem:[%s2723_s8 + $0x60] sm:$0xff]  }
 0x958   :  { %2041 = vmatprep.subr.bf16.mxu1 %v2157_v17 }
 0x959   :  { %v662_v42 = vrot.slane %v2464_v45, %v2603_v13  ;;  %v1135_v44 = vrot.slane %v2122_v19, %v2603_v13  ;;  %v778_v40 = vrot.slane %v2502_v4, %v2603_v13  ;;  %v902_v2 = vrot.slane %v2527_v37, %v2603_v13 }
 0x95a   :  { %v1019_v5 = vrot.slane %v2554_v58, %v2603_v13 }
 0x95b   :  { %2042 = vmatpush3.bf16.msra.mxu1 %v2428_v14  ;;  %v1724_v43 = vrot.slane %v662_v42, 9  ;;  %v1736_v46 = vrot.slane %v1135_v44, 9  ;;  %v1727_v45 = vrot.slane %v778_v40, 9  ;;  %v1730_v3 = vrot.slane %v902_v2, 9 }
 0x95c   :  { %v1733_v6 = vrot.slane %v1019_v5, 9 }
 0xa19   :  { %v1236_v7 = vpop.f32.mrb[24].mxu1 }
 0xa1a   :  { %v1237_v9 = vadd.f32 %v2460_v32, %v1236_v7  ;;  %v2005_v31 = vpop.f32.mrb[25].mxu1  ;;  %v2091_v7 = vld [vmem:[%s2723_s8 + $0x58] sm:$0xff]  }
 0xa1b   :  { %v1239_v11 = vpop.f32.mrb[26].mxu1 }
 0xa1c   :  { %2125 = vtanh.f32 %v1237_v9  ;;  %v2006_v35 = vpop.f32.mrb[27].mxu1  ;;  %v2092_v9 = vld [vmem:[%s2723_s8 + $0x18] sm:$0xff]  }
 0xa21   :  { %v2600_v38 = vpop.f32.mrb[28].mxu1 }
 0xa22   :  { %v2033_v12 = vpop.f32.mrb[29].mxu1  ;;  %v1426_v37 = vrot.slane %v2600_v38, 2  ;;  %v2094_v38 = vld [vmem:[%s2723_s8 + $0x20] sm:$0xff]  }
 0xa23   :  { %v1422_v39 = vpop.f32.mrb[30].mxu1  ;;  %v2095_v12 = vld [vmem:[%s2723_s8 + $0x68] sm:$0xff]  }
 0xa24   :  { %v2034_v17 = vpop.f32.mrb[31].mxu1  ;;  %v1428_v15 = vadd.f32 %v1426_v37, %v2437_v20  ;;  %v2085_v20 = vld [vmem:[%s2723_s8 + $0x40] sm:$0xff]   ;;  %v2097_v39 = vld [vmem:[%s2723_s8 + $0x70] sm:$0xff]  }
 0xa25   :  { %1839 = vmatprep.subr.bf16.mxu0 %v2085_v20  ;;  %v2098_v17 = vld [vmem:[%s2723_s8 + $0x30] sm:$0xff]  }
 0xa26   :  { %v2126_v41 = vpop.eup %2125 }
 0xa27   :  { %v1312_v14 = vrot.slane %v2126_v41, 4  ;;  %v1250_v47 = vrot.slane %v2126_v41, %v2603_v13  ;;  %v2099_v41 = vld [vmem:[%s2723_s8 + $0x78] sm:$0xff]  }
 0xa29   :  { %1313 = vrot.lane.b32.xlu1 %v1312_v14, %s2160_s7  ;;  %v1739_v48 = vrot.slane %v1250_v47, 9 }
 0xa2d   :  { %665 = vrot.lane.b32.xlu1 %v1724_v43, %s2160_s7  ;;  %v2100_v43 = vld [vmem:[%s2723_s8 + $0x38] sm:$0xff]  }
 0xa31   :  { %1138 = vrot.lane.b32.xlu1 %v1736_v46, %s2160_s7 }
 0xa35   :  { %779 = vrot.lane.b32.xlu1 %v778_v40, %s2162_s12 }
 0xa39   :  { %1251 = vrot.lane.b32.xlu1 %v1250_v47, %s2162_s12 }
 0xa3d   :  { %786 = vrot.lane.b32.xlu1 %v1727_v45, %s2163_s13 }
 0xa41   :  { %1257 = vrot.lane.b32.xlu1 %v1739_v48, %s2163_s13 }
 0xa9b   :  { %v1314_v49 = vpop.permute.xlu1 %1313 }
 0xa9c   :  { %v1316_v50 = vsel %vm536_vm11, %v2124_v28, %v1314_v49  ;;  %v2088_v28 = vld [vmem:[%s2723_s8 + $0x8] sm:$0xff]  }
 0xa9d   :  { %v1317_v51 = vpack.c.bf16 %v1316_v50, %v1316_v50  ;;  %v1747_v50 = vld [vmem:[%s2724_s9] ss:$0 sm:$0xff] }
 0xa9f   :  { %v1319_v4 = vrot.slane %v1317_v51, 2  ;;  %v666_v52 = vpop.permute.xlu1 %665 }
 0xaa0   :  { %669 = vst.msk [vmem:[#allocation2] sm:$0x1] %vm668_vm14, %v666_v52 }
 0xaa1   :  { %2024 = vmatmul.mubr.msk.bf16.vlgmr.msra.gmra.mrb[32].mxu0 %vm608_vm12, %v1319_v4 }
 0xaa2   :  { %1840 = vmatpush3.bf16.msra.mxu0 %v2086_v22 }
 0xaa3   :  { %v1139_v54 = vpop.permute.xlu1 %1138  ;;  %1841 = vmatprep.subr.bf16.mxu0 %v2087_v27 }
 0xaa4   :  { %1141 = vst.msk [vmem:[#allocation2 + $0x1] sm:$0x1] %vm668_vm14, %v1139_v54 }
 0xaa6   :  { %1842 = vmatpush3.bf16.msra.mxu0 %v2088_v28 }
 0xaa7   :  { %v780_v55 = vpop.permute.xlu1 %779  ;;  %1843 = vmatprep.subr.bf16.mxu0 %v2089_v29 }
 0xaa8   :  { %783 = vst.msk [vmem:[#allocation2] sm:$0x1] %vm782_vm15, %v780_v55 }
 0xaaa   :  { %1844 = vmatpush3.bf16.msra.mxu0 %v2090_v30 }
 0xaab   :  { %v1252_v56 = vpop.permute.xlu1 %1251  ;;  %1845 = vmatprep.subr.bf16.mxu0 %v2091_v7 }
 0xaac   :  { %1254 = vst.msk [vmem:[#allocation2 + $0x1] sm:$0x1] %vm782_vm15, %v1252_v56 }
 0xaae   :  { %1846 = vmatpush3.bf16.msra.mxu0 %v2092_v9 }
 0xaaf   :  { %v787_v57 = vpop.permute.xlu1 %786  ;;  %1847 = vmatprep.subr.bf16.mxu0 %v2093_v36 }
 0xab0   :  { %790 = vst.msk [vmem:[#allocation2] sm:$0x1] %vm789_vm0, %v787_v57 }
 0xab2   :  { %1848 = vmatpush3.bf16.msra.mxu0 %v2094_v38 }
 0xab3   :  { %v1258_v59 = vpop.permute.xlu1 %1257  ;;  %1849 = vmatprep.subr.bf16.mxu0 %v2095_v12 }
 0xab4   :  { %1260 = vst.msk [vmem:[#allocation2 + $0x1] sm:$0x1] %vm789_vm0, %v1258_v59 }
 0xb74   :  { %v1357_v60 = vpop.f32.mrb[32].mxu0 }
 0xb75   :  { %v1358_v61 = vadd.f32 %v2460_v32, %v1357_v60  ;;  %v2025_v62 = vpop.f32.mrb[33].mxu0 }
 0xb76   :  { %v1360_v63 = vpop.f32.mrb[34].mxu0 }
 0xb77   :  { %2127 = vtanh.f32 %v1358_v61  ;;  %v2026_v0 = vpop.f32.mrb[35].mxu0 }
 0xb78   :  { %2129 = vtanh.f32 %v1428_v15 }
 0xb81   :  { %v2128_v53 = vpop.eup %2127 }
 0xb82   :  { %1364 = vst.msk [vmem:[#allocation2 + $0x3] sm:$0x1] %vm653_vm13, %v2128_v53  ;;  %v1430_v1 = vrot.slane %v2128_v53, 2  ;;  %v1372_v8 = vrot.slane %v2128_v53, %v2603_v13  ;;  %v2130_v16 = vpop.eup %2129 }
 0xb84   :  { %1431 = vrot.lane.b32.xlu0 %v1430_v1, %s2160_s7  ;;  %v1742_v10 = vrot.slane %v1372_v8, 9 }
 0xb88   :  { %905 = vrot.lane.b32.xlu0 %v1730_v3, %s2160_s7 }
 0xb8c   :  { %1020 = vrot.lane.b32.xlu0 %v1019_v5, %s2162_s12 }
 0xb90   :  { %1026 = vrot.lane.b32.xlu0 %v1733_v6, %s2163_s13 }
 0xb94   :  { %1375 = vrot.lane.b32.xlu0 %v1742_v10, %s2160_s7 }
 0xbf6   :  { %v1432_v18 = vpop.permute.xlu0 %1431 }
 0xbf7   :  { %v1434_v19 = vsel %vm536_vm11, %v2130_v16, %v1432_v18 }
 0xbf8   :  { %v1435_v58 = vpack.c.bf16 %v1434_v19, %v1434_v19 }
 0xbfa   :  { %v1437_v21 = vrot.slane %v1435_v58, 3  ;;  %v906_v23 = vpop.permute.xlu0 %905 }
 0xbfb   :  { %908 = vst.msk [vmem:[#allocation2 + $0x2] sm:$0x1] %vm668_vm14, %v906_v23 }
 0xbfc   :  { %2044 = vmatmul.mubr.msk.bf16.vlgmr.msra.gmra.mrb[32].mxu1 %vm608_vm12, %v1437_v21 }
 0xbfe   :  { %v1021_v24 = vpop.permute.xlu0 %1020 }
 0xbff   :  { %1023 = vst.msk [vmem:[#allocation2 + $0x2] sm:$0x1] %vm782_vm15, %v1021_v24 }
 0xc02   :  { %v1027_v25 = vpop.permute.xlu0 %1026 }
 0xc03   :  { %1029 = vst.msk [vmem:[#allocation2 + $0x2] sm:$0x1] %vm789_vm0, %v1027_v25 }
 0xc06   :  { %v1376_v26 = vpop.permute.xlu0 %1375 }
 0xc07   :  { %1378 = vst.msk [vmem:[#allocation2 + $0x3] sm:$0x1] %vm668_vm14, %v1376_v26 }
 0xccf   :  { %v1475_v31 = vpop.f32.mrb[32].mxu1 }
 0xcd0   :  { %v1476_v11 = vadd.f32 %v2460_v32, %v1475_v31  ;;  %v2045_v33 = vpop.f32.mrb[33].mxu1  ;;  %v2096_v32 = vld [vmem:[%s2723_s8 + $0x28] sm:$0xff]  }
 0xcd1   :  { %v1478_v34 = vpop.f32.mrb[34].mxu1  ;;  %1850 = vmatpush3.bf16.msra.mxu0 %v2096_v32 }
 0xcd2   :  { %2131 = vtanh.f32 %v1476_v11  ;;  %v2046_v35 = vpop.f32.mrb[35].mxu1  ;;  %1851 = vmatprep.subr.bf16.mxu0 %v2097_v39 }
 0xcd5   :  { %1852 = vmatpush3.bf16.msra.mxu0 %v2098_v17 }
 0xcd6   :  { %1853 = vmatprep.subr.bf16.mxu0 %v2099_v41 }
 0xcd9   :  { %1854 = vmatpush3.bf16.msra.mxu0 %v2100_v43 }
 0xcdc   :  { %v2132_v14 = vpop.eup %2131 }
 0xcdd   :  { %v1489_v42 = vrot.slane %v2132_v14, %v2603_v13 }
 0xcdf   :  { %1490 = vrot.lane.b32.xlu0 %v1489_v42, %s2162_s12  ;;  %v1745_v44 = vrot.slane %v1489_v42, 9  ;;  %s2164_s12 = smov [#allocation3]  }
 0xce3   :  { %1496 = vrot.lane.b32.xlu0 %v1745_v44, %s2163_s13  ;;  %s1697_s13 = sshll.u32 %s2164_s12, 4  ;;  %s1698_s13 = int_to_ptr.vmem [resolvable:$true] %s1697_s13 }
 0xce4   :  { %s2133_s21 = scalar_lea.vmem %s1698_s13, 32  ;;  %p2138_p1 = scmp.lt.s32.totalorder %s1698_s13, %s1698_s13 }
 0xce5   :  { %p2134_p0 = scmp.ne.s32.totalorder %s1698_s13, %s2133_s21  ;;  %p2139_p2 = scmp.lt.s32.totalorder %s2133_s21, %s2133_s21 }
 0xce7   :  { %p2140_p3 = por %p2139_p2, %p2138_p1 }
 0xce9   :  { %p2141_p4 = pnand %p2140_p3, %p2134_p0 }
 0xd51   :  { %v1491_v46 = vpop.permute.xlu0 %1490 }
 0xd52   :  { %1493 = vst.msk [vmem:[#allocation2 + $0x3] sm:$0x1] %vm782_vm15, %v1491_v46 }
 0xd55   :  { %v1497_v40 = vpop.permute.xlu0 %1496 }
 0xd56   :  { %1499 = vst.msk [vmem:[#allocation2 + $0x3] sm:$0x1] %vm789_vm0, %v1497_v40 }
 0xd5d   :  { %v1746_v47 = vld.sshfl [vmem:[#allocation2] sm:$0x33 pattern:$0x76325410] }
 0xd5e   :  { %v1509_v13 = vcombine.high %v1746_v47, %v1746_v47  ;;  %v1512_v48 = vpack.c.bf16 %v1746_v47, %v1746_v47 }
 0xd60   :  { %v1513_v45 = vpack.c.bf16 %v1509_v13, %v1509_v13 }
 0xd62   :  { %1681 = vmatprep.mubr.bf16.mxu0 %v1513_v45 }
 0xd63   :  { %1682 = vmatmul.mubr.bf16.vlgmr.msra.gmra.mrb[36].mxu0 %v1512_v48 }
 0xe36   :  { %v1855_v49 = vpop.f32.mrb[36].mxu0 }
 0xe37   :  { %v1856_v51 = vpop.f32.mrb[37].mxu0 }
 0xe38   :  { %v1857_v4 = vadd.f32 %v1856_v51, %v1855_v49  ;;  %v1858_v52 = vpop.f32.mrb[38].mxu0 }
 0xe39   :  { %v1859_v54 = vpop.f32.mrb[39].mxu0 }
 0xe3a   :  { %v1684_v55 = vadd.f32 %v1857_v4, %v1747_v50 }
 0xe3c   :  { %1690 = vst.msk [vmem:[#allocation3] sm:$0x3] %vm1689_vm1, %v1684_v55 }
 0xe3d   :  { %2144 = shalt.err (!%p2141_p4)
}
 0xe3e   :  { %s2145_s9 = scalar_lea.hbm %s2725_s10, 32 }
 0xe3f   :  { %p2146_p5 = scmp.ne.s32.totalorder %s2725_s10, %s2145_s9  ;;  %p2149_p6 = scmp.lt.u32.totalorder %s2145_s9, %s2725_s10 }
 0xe41   :  { %p2151_p7 = pnand %p2149_p6, %p2146_p5 }
 0xe43   :  { %2154 = shalt.err (!%p2151_p7)
}
 0xe44   :  { %1700 = dma.vmem_to_hbm [thread:$0]  %s1698_s13, 32, %s2725_s10, [#allocation4]  }
 0xe45   :  { %2155 = dma.done.wait [#allocation4], 32  }
 0xe46   :  { %2156 = vsyncadd [#allocation4], 4294967264 }
 0xe47   :  { %1704 = vsyncpa [#allocation4], 1 }

</bundles_post_ra>
